<compile_context>
chip_gen: v5e
topology: v5e:2x2
jax: 0.10.0
libtpu: 0.0.40
codegen_flags: <defaults>
</compile_context>

<pallas_src>
import functools
import math

import jax
import jax.numpy as jnp
from jax.experimental import pallas as pl
from jax.experimental.pallas import tpu as pltpu


# ----------------------------- Pallas kernel ------------------------------ #
def _tap(xb, kh, kw, th, wo, stride):
    """(th, wo, Cin) input window for kernel tap (kh, kw) of the current tile."""
    if stride == 1:
        return xb[kh:kh + th, kw:kw + wo, :]
    # stride > 1: contiguous slices + static reshape decimation (no strided
    # sublane gathers in the inner loop).
    cin = xb.shape[-1]
    rows = xb[kh:kh + th * stride]                               # (th*s, Wb, Cin)
    rows = rows.reshape(th, stride, rows.shape[1], cin)[:, 0]    # (th, Wb, Cin)
    cols = rows[:, kw:kw + wo * stride, :]                       # (th, wo*s, Cin)
    cols = cols.reshape(th, wo, stride, cin)[:, :, 0, :]         # (th, wo, Cin)
    return cols


def _conv_bn_relu_kernel(w_ref, scale_ref, shift_ref, x_ref, o_ref, acc_ref, *,
                         ks, th, wo, stride, hblk, whole_h, fold_taps,
                         apply_bn, neg_slope):
    # w_ref : (ks*ks*Cin, TCout) bf16 (fold) or (ks*ks, Cin, TCout) bf16
    # x_ref : (1, Hp, Wb, Cin) bf16 (resident) or (1, Hblk, Wb, Cin) (windowed)
    # o_ref : (1, TH, Wo, TCout)
    # acc_ref: (TH*Wo, TCout) f32 VMEM scratch (used by the per-tap path)
    if whole_h:
        # whole padded image resident in VMEM; select this tile's rows.
        row0 = pl.program_id(2) * (th * stride)
        xb = x_ref[0, pl.ds(row0, hblk)]                         # (Hblk, Wb, Cin)
    else:
        xb = x_ref[0]                                            # (Hblk, Wb, Cin)
    cin = xb.shape[-1]

    if fold_taps:
        # Small Cin: pack all ks*ks taps into the contraction dim -> one fat
        # MXU matmul with K = ks*ks*Cin instead of ks*ks dots with K = Cin.
        taps = []
        for kh in range(ks):
            for kw in range(ks):
                taps.append(_tap(xb, kh, kw, th, wo, stride).reshape(th * wo, cin))
        patch = jnp.concatenate(taps, axis=-1)                   # (M, ks*ks*Cin)
        acc = jnp.dot(patch, w_ref[...], preferred_element_type=jnp.float32)
    else:
        # Large Cin: the MXU K dim is already full; accumulate per-tap dots in
        # a VMEM f32 scratch so the accumulator never spills.
        acc_ref[...] = jnp.zeros(acc_ref.shape, jnp.float32)
        for kh in range(ks):
            for kw in range(ks):
                a = _tap(xb, kh, kw, th, wo, stride).reshape(th * wo, cin)
                acc_ref[...] += jnp.dot(a, w_ref[kh * ks + kw],
                                        preferred_element_type=jnp.float32)
        acc = acc_ref[...]

    if apply_bn:
        acc = acc * scale_ref[...] + shift_ref[...]
        acc = jnp.where(acc >= 0, acc, neg_slope * acc)          # leaky_relu
    # Spec module: norm_layer=None => identity, no activation (matches PyTorch).

    o_ref[0] = acc.reshape(th, wo, -1).astype(o_ref.dtype)


# ------------------------------ wrappers ----------------------------------- #
def _pick_th(ho, wo, stride, ks, cin, tcout, out_itemsize):
    """Largest row tile (<=16) dividing Ho whose per-step working set fits."""
    budget = 8 * 2 ** 20
    for cand in (16, 8, 4, 2, 1):
        if ho % cand:
            continue
        blk_in = (cand * stride + ks - 1) * (wo * stride + ks - 1) * cin * 2
        blk_out = cand * wo * tcout * out_itemsize
        blk_acc = cand * wo * tcout * 4
        if 2 * blk_in + 2 * blk_out + blk_acc <= budget:
            return cand
    return 1


def conv_bn_relu_nhwc(x_nhwc, weight, *, stride=1, padding=1,
                      bn_scale=None, bn_shift=None, neg_slope=0.01,
                      out_dtype=jnp.bfloat16, keep_padded_cout=False):
    """Fused conv (+ optional folded BN + leaky_relu) on NHWC activations.

    Returns (N, Ho, Wo, Cout); with keep_padded_cout=True returns
    (N, Ho, Wo, Cout_pad) with zero extra channels so layers can be chained
    without any layout / slice passes between them.
    """
    N, H, W, Cin = x_nhwc.shape
    Cout, Cin_w, ks, ks2 = weight.shape
    assert Cin_w == Cin and ks == ks2

    Ho = (H + 2 * padding - ks) // stride + 1
    Wo = (W + 2 * padding - ks) // stride + 1
    Cout_pad = ((Cout + 127) // 128) * 128          # lane-dense output channels

    # Cout tile: >=256 fills the v6e/v7x 2x256x256 MXU N dim; tiling also keeps
    # the double-buffered weight block of the deepest layers inside v7x VMEM.
    if Cout_pad <= 512:
        TCout = Cout_pad
    elif Cout_pad % 512 == 0:
        TCout = 512
    elif Cout_pad % 256 == 0:
        TCout = 256
    else:
        TCout = 128
    n_co = Cout_pad // TCout

    out_itemsize = jnp.dtype(out_dtype).itemsize
    TH = _pick_th(Ho, Wo, stride, ks, Cin, TCout, out_itemsize)
    n_h = Ho // TH
    Hblk = TH * stride + ks - 1                     # input rows per row tile
    Wb = Wo * stride + ks - 1                       # padded width (full block)
    Hp = (n_h - 1) * TH * stride + Hblk             # padded height (in-bounds)

    # bf16 MXU operands; one spatial zero-pad in HBM.
    xp = jnp.pad(x_nhwc.astype(jnp.bfloat16),
                 ((0, 0), (padding, Hp - H - padding),
                  (padding, Wb - W - padding), (0, 0)))

    # (Cout, Cin, kh, kw) -> (kh, kw, Cin, Cout_pad), bf16, zero-padded lanes.
    wt = jnp.transpose(weight, (2, 3, 1, 0)).astype(jnp.bfloat16)
    wt = jnp.pad(wt, ((0, 0), (0, 0), (0, 0), (0, Cout_pad - Cout)))

    fold_taps = Cin < 128                           # fold taps when K underfilled
    if fold_taps:
        w_arr = wt.reshape(ks * ks * Cin, Cout_pad)
        w_spec = pl.BlockSpec((ks * ks * Cin, TCout), lambda n, co, h: (0, co))
    else:
        w_arr = wt.reshape(ks * ks, Cin, Cout_pad)
        w_spec = pl.BlockSpec((ks * ks, Cin, TCout), lambda n, co, h: (0, 0, co))

    apply_bn = bn_scale is not None
    if apply_bn:
        scale = jnp.pad(bn_scale.reshape(1, Cout).astype(jnp.float32),
                        ((0, 0), (0, Cout_pad - Cout)), constant_values=1.0)
        shift = jnp.pad(bn_shift.reshape(1, Cout).astype(jnp.float32),
                        ((0, 0), (0, Cout_pad - Cout)))
    else:
        scale = jnp.ones((1, Cout_pad), jnp.float32)
        shift = jnp.zeros((1, Cout_pad), jnp.float32)

    # Input strategy: small images stay fully resident in VMEM (each activation
    # row is DMA'd exactly once per image/Cout tile); large images use
    # overlapping element-indexed row windows (~(TH+ks-1)/TH read amplification
    # instead of the previous ks x).
    whole_h = 2 * Hp * Wb * Cin * 2 <= 8 * 2 ** 20
    if whole_h:
        x_spec = pl.BlockSpec((1, Hp, Wb, Cin), lambda n, co, h: (n, 0, 0, 0))
        in_bytes = N * n_co * Hp * Wb * Cin * 2
    else:
        x_spec = pl.BlockSpec((1, pl.Element(Hblk), Wb, Cin),
                              lambda n, co, h: (n, h * TH * stride, 0, 0))
        in_bytes = N * n_co * n_h * Hblk * Wb * Cin * 2

    kernel = functools.partial(
        _conv_bn_relu_kernel, ks=ks, th=TH, wo=Wo, stride=stride, hblk=Hblk,
        whole_h=whole_h, fold_taps=fold_taps, apply_bn=apply_bn,
        neg_slope=neg_slope)

    # VMEM budget: double-buffered input/output/weight blocks + f32 scratch,
    # clamped to ~80% of physical per-core VMEM (64 MiB v7x, 128 MiB v5e/v6e).
    blk_in = (Hp if whole_h else Hblk) * Wb * Cin * 2
    blk_out = TH * Wo * TCout * out_itemsize
    blk_w = ks * ks * Cin * TCout * 2
    blk_acc = TH * Wo * TCout * 4
    need = 2 * blk_in + 2 * blk_out + 2 * blk_w + blk_acc + 4 * 2 * TCout * 4
    try:
        phys_vmem = pltpu.get_tpu_info().vmem_capacity_bytes
    except Exception:
        phys_vmem = 64 * 2 ** 20
    vmem_limit = int(min(int(phys_vmem * 0.8), max(16 * 2 ** 20, 2 * need)))

    cost = pl.CostEstimate(
        flops=2 * N * Ho * Wo * ks * ks * Cin * Cout_pad,
        transcendentals=0,
        bytes_accessed=(in_bytes
                        + N * n_co * ks * ks * Cin * TCout * 2
                        + N * Ho * Wo * Cout_pad * out_itemsize))

    out = pl.pallas_call(
        kernel,
        out_shape=jax.ShapeDtypeStruct((N, Ho, Wo, Cout_pad), out_dtype),
        grid_spec=pltpu.PrefetchScalarGridSpec(
            num_scalar_prefetch=0,
            # h innermost: weight/scale/shift blocks stay resident while the
            # kernel streams down the image; no reduction axis -> all parallel.
            grid=(N, n_co, n_h),
            in_specs=[
                w_spec,
                pl.BlockSpec((1, TCout), lambda n, co, h: (0, co)),
                pl.BlockSpec((1, TCout), lambda n, co, h: (0, co)),
                x_spec,
            ],
            out_specs=pl.BlockSpec((1, TH, Wo, TCout),
                                   lambda n, co, h: (n, h, 0, co)),
            scratch_shapes=[pltpu.VMEM((TH * Wo, TCout), jnp.float32)],
        ),
        compiler_params=pltpu.CompilerParams(
            dimension_semantics=("parallel", "parallel", "parallel"),
            vmem_limit_bytes=vmem_limit),
        cost_estimate=cost,
    )(w_arr, scale, shift, xp)

    if keep_padded_cout:
        return out
    return out[..., :Cout]


def conv_bn_relu(x, weight, *, stride=1, padding=1, bn_scale=None,
                 bn_shift=None, neg_slope=0.01, out_dtype=None):
    """Drop-in ConvBNReLU.forward on NCHW tensors (the PyTorch module layout)."""
    if out_dtype is None:
        out_dtype = x.dtype
    y = conv_bn_relu_nhwc(jnp.transpose(x, (0, 2, 3, 1)), weight,
                          stride=stride, padding=padding, bn_scale=bn_scale,
                          bn_shift=bn_shift, neg_slope=neg_slope,
                          out_dtype=out_dtype, keep_padded_cout=True)
    # channel slice + NHWC->NCHW fuse into the single unavoidable boundary copy
    return jnp.transpose(y[..., :weight.shape[0]], (0, 3, 1, 2))


# ----------------------------- parameter init ------------------------------ #
def init_conv_weight(key, out_chan, in_chan, ks):
    # kaiming_normal_(a=1): gain = sqrt(2/(1+1^2)) = 1, fan_in = Cin*ks*ks
    fan_in = in_chan * ks * ks
    std = 1.0 / math.sqrt(fan_in)
    return std * jax.random.normal(key, (out_chan, in_chan, ks, ks),
                                   dtype=jnp.float32)


if __name__ == "__main__":
    key = jax.random.PRNGKey(0)
    kx, kw_, ksc, ksh, kx3, kw3, kx4 = jax.random.split(key, 7)

    def conv_ref(x, w, stride, padding):
        # Reference on the same bf16-rounded operands the kernel feeds the MXU
        # (activations and weights are bf16 in the kernel, accumulation is f32).
        xb = x.astype(jnp.bfloat16).astype(jnp.float32)
        wb = w.astype(jnp.bfloat16).astype(jnp.float32)
        return jax.lax.conv_general_dilated(
            xb, wb, window_strides=(stride, stride),
            padding=[(padding, padding), (padding, padding)],
            dimension_numbers=("NCHW", "OIHW", "NCHW"),
            preferred_element_type=jnp.float32)

    # 1) Default module config (norm_layer=None -> plain conv, no activation),
    #    small-Cin tap-folded MXU path.
    N, Cin, H, W = 2, 4, 16, 16
    Cout, ks, stride, padding = 8, 3, 1, 1
    x = jax.random.normal(kx, (N, Cin, H, W), dtype=jnp.float32)
    weight = init_conv_weight(kw_, Cout, Cin, ks)
    y = jax.block_until_ready(conv_bn_relu(x, weight, stride=stride,
                                           padding=padding))
    y_ref = conv_ref(x, weight, stride, padding)
    assert y.shape == (N, Cout, H, W)
    assert jnp.allclose(y, y_ref, atol=1e-3, rtol=1e-3)

    # 2) norm_layer != None -> folded per-channel affine BN + leaky_relu, fused.
    bn_scale = 1.0 + 0.1 * jax.random.normal(ksc, (Cout,), jnp.float32)
    bn_shift = 0.1 * jax.random.normal(ksh, (Cout,), jnp.float32)
    y2 = jax.block_until_ready(
        conv_bn_relu(x, weight, stride=stride, padding=padding,
                     bn_scale=bn_scale, bn_shift=bn_shift))
    z = y_ref * bn_scale.reshape(1, Cout, 1, 1) + bn_shift.reshape(1, Cout, 1, 1)
    y2_ref = jnp.where(z >= 0, z, 0.01 * z)
    assert jnp.allclose(y2, y2_ref, atol=1e-3, rtol=1e-3)

    # 3) Large-Cin layer (Cin >= 128): per-tap dots + VMEM f32 accumulator path.
    N3, C3, H3, W3, Cout3 = 1, 128, 8, 8, 32
    x3 = jax.random.normal(kx3, (N3, C3, H3, W3), dtype=jnp.float32)
    w3 = init_conv_weight(kw3, Cout3, C3, ks)
    y3 = jax.block_until_ready(conv_bn_relu(x3, w3))
    y3_ref = conv_ref(x3, w3, 1, 1)
    assert y3.shape == (N3, Cout3, H3, W3)
    assert jnp.allclose(y3, y3_ref, atol=2e-3, rtol=2e-3)

    # 4) NHWC / bf16-output chaining path with multiple row tiles per image
    #    (no NCHW<->NHWC or channel-slice passes between layers).
    N4, C4, H4, W4 = 1, 4, 48, 16
    x4 = jax.random.normal(kx4, (N4, C4, H4, W4), dtype=jnp.float32)
    y4 = jax.block_until_ready(
        conv_bn_relu_nhwc(jnp.transpose(x4, (0, 2, 3, 1)), weight))
    assert y4.dtype == jnp.bfloat16 and y4.shape == (N4, H4, W4, Cout)
    y4_ref = conv_ref(x4, weight, 1, 1)
    y4_nchw = jnp.transpose(y4, (0, 3, 1, 2)).astype(jnp.float32)
    assert jnp.allclose(y4_nchw, y4_ref, atol=2e-2, rtol=2e-2)

    print("KERNEL_OK")
</pallas_src>

<mosaic_0001>
module attributes {stable_mosaic.version = 11 : i64} {
  func.func @_conv_bn_relu_kernel(%arg0: i32, %arg1: i32, %arg2: i32, %arg3: memref<36x128xbf16, #tpu.memory_space<vmem>>, %arg4: memref<1x128xf32, #tpu.memory_space<vmem>>, %arg5: memref<1x128xf32, #tpu.memory_space<vmem>>, %arg6: memref<1x18x18x4xbf16, #tpu.memory_space<vmem>>, %arg7: memref<1x16x16x128xf32, #tpu.memory_space<vmem>>, %arg8: memref<256x128xf32, #tpu.memory_space<vmem>>) attributes {dimension_semantics = [#tpu.dimension_semantics<parallel>, #tpu.dimension_semantics<parallel>, #tpu.dimension_semantics<parallel>], iteration_bounds = array<i64: 2, 1, 1>, scalar_prefetch = 0 : i64, scratch_operands = 1 : i64, tpu.core_type = #tpu.core_type<tc>, window_params = [{transform_indices = @transform_0, window_bounds = array<i64: 36, 128>}, {transform_indices = @transform_1, window_bounds = array<i64: 1, 128>}, {transform_indices = @transform_2, window_bounds = array<i64: 1, 128>}, {transform_indices = @transform_3, window_bounds = array<i64: 1, 18, 18, 4>}, {transform_indices = @transform_4, window_bounds = array<i64: 1, 16, 16, 128>}]} {
    %c16_i32 = arith.constant 16 : i32
    %0 = arith.muli %arg2, %c16_i32 : i32
    %c0 = arith.constant 0 : index
    %1 = arith.index_cast %0 : i32 to index
    %c0_0 = arith.constant 0 : index
    %c0_1 = arith.constant 0 : index
    %2 = vector.load %arg6[%c0, %1, %c0_0, %c0_1] : memref<1x18x18x4xbf16, #tpu.memory_space<vmem>>, vector<1x18x18x4xbf16>
    %3 = vector.shape_cast %2 : vector<1x18x18x4xbf16> to vector<18x18x4xbf16>
    %4 = vector.extract_strided_slice %3 {offsets = [0, 0, 0], sizes = [16, 16, 4], strides = [1, 1, 1]} : vector<18x18x4xbf16> to vector<16x16x4xbf16>
    %5 = vector.shape_cast %4 : vector<16x16x4xbf16> to vector<256x4xbf16>
    %6 = vector.extract_strided_slice %3 {offsets = [0, 1, 0], sizes = [16, 16, 4], strides = [1, 1, 1]} : vector<18x18x4xbf16> to vector<16x16x4xbf16>
    %7 = vector.shape_cast %6 : vector<16x16x4xbf16> to vector<256x4xbf16>
    %8 = vector.extract_strided_slice %3 {offsets = [0, 2, 0], sizes = [16, 16, 4], strides = [1, 1, 1]} : vector<18x18x4xbf16> to vector<16x16x4xbf16>
    %9 = vector.shape_cast %8 : vector<16x16x4xbf16> to vector<256x4xbf16>
    %10 = vector.extract_strided_slice %3 {offsets = [1, 0, 0], sizes = [16, 16, 4], strides = [1, 1, 1]} : vector<18x18x4xbf16> to vector<16x16x4xbf16>
    %11 = vector.shape_cast %10 : vector<16x16x4xbf16> to vector<256x4xbf16>
    %12 = vector.extract_strided_slice %3 {offsets = [1, 1, 0], sizes = [16, 16, 4], strides = [1, 1, 1]} : vector<18x18x4xbf16> to vector<16x16x4xbf16>
    %13 = vector.shape_cast %12 : vector<16x16x4xbf16> to vector<256x4xbf16>
    %14 = vector.extract_strided_slice %3 {offsets = [1, 2, 0], sizes = [16, 16, 4], strides = [1, 1, 1]} : vector<18x18x4xbf16> to vector<16x16x4xbf16>
    %15 = vector.shape_cast %14 : vector<16x16x4xbf16> to vector<256x4xbf16>
    %16 = vector.extract_strided_slice %3 {offsets = [2, 0, 0], sizes = [16, 16, 4], strides = [1, 1, 1]} : vector<18x18x4xbf16> to vector<16x16x4xbf16>
    %17 = vector.shape_cast %16 : vector<16x16x4xbf16> to vector<256x4xbf16>
    %18 = vector.extract_strided_slice %3 {offsets = [2, 1, 0], sizes = [16, 16, 4], strides = [1, 1, 1]} : vector<18x18x4xbf16> to vector<16x16x4xbf16>
    %19 = vector.shape_cast %18 : vector<16x16x4xbf16> to vector<256x4xbf16>
    %20 = vector.extract_strided_slice %3 {offsets = [2, 2, 0], sizes = [16, 16, 4], strides = [1, 1, 1]} : vector<18x18x4xbf16> to vector<16x16x4xbf16>
    %21 = vector.shape_cast %20 : vector<16x16x4xbf16> to vector<256x4xbf16>
    %22 = tpu.concatenate %5, %7, %9, %11, %13, %15, %17, %19, %21 in 1 : vector<256x4xbf16>, vector<256x4xbf16>, vector<256x4xbf16>, vector<256x4xbf16>, vector<256x4xbf16>, vector<256x4xbf16>, vector<256x4xbf16>, vector<256x4xbf16>, vector<256x4xbf16> -> vector<256x36xbf16>
    %c0_2 = arith.constant 0 : index
    %c0_3 = arith.constant 0 : index
    %23 = vector.load %arg3[%c0_2, %c0_3] : memref<36x128xbf16, #tpu.memory_space<vmem>>, vector<36x128xbf16>
    %cst = arith.constant dense<0.000000e+00> : vector<256x128xf32>
    %24 = tpu.matmul %22, %23, %cst {dimension_numbers = #tpu.dot_dimension_numbers<[1], [0], [0], [1], [0, 0, 1, 1], [], []>} : vector<256x36xbf16>, vector<36x128xbf16>, vector<256x128xf32> -> vector<256x128xf32>
    %25 = vector.shape_cast %24 : vector<256x128xf32> to vector<16x16x128xf32>
    %c0_4 = arith.constant 0 : index
    %c0_5 = arith.constant 0 : index
    %c0_6 = arith.constant 0 : index
    %c0_7 = arith.constant 0 : index
    %26 = vector.load %arg7[%c0_4, %c0_5, %c0_6, %c0_7] : memref<1x16x16x128xf32, #tpu.memory_space<vmem>>, vector<1x16x16x128xf32>
    %27 = vector.shape_cast %26 : vector<1x16x16x128xf32> to vector<16x16x128xf32>
    %28 = vector.shape_cast %25 : vector<16x16x128xf32> to vector<1x16x16x128xf32>
    tpu.vector_store %arg7[%c0_4, %c0_5, %c0_6, %c0_7], %28 {strides = array<i32>} : memref<1x16x16x128xf32, #tpu.memory_space<vmem>>, vector<1x16x16x128xf32>,
    return
  }
  func.func @transform_0(%arg0: i32, %arg1: i32, %arg2: i32) -> (i32, i32) {
    %c0_i32 = arith.constant 0 : i32
    %c0_i32_0 = arith.constant 0 : i32
    return %c0_i32, %arg1 : i32, i32
  }
  func.func @transform_1(%arg0: i32, %arg1: i32, %arg2: i32) -> (i32, i32) {
    %c0_i32 = arith.constant 0 : i32
    %c0_i32_0 = arith.constant 0 : i32
    return %c0_i32, %arg1 : i32, i32
  }
  func.func @transform_2(%arg0: i32, %arg1: i32, %arg2: i32) -> (i32, i32) {
    %c0_i32 = arith.constant 0 : i32
    %c0_i32_0 = arith.constant 0 : i32
    return %c0_i32, %arg1 : i32, i32
  }
  func.func @transform_3(%arg0: i32, %arg1: i32, %arg2: i32) -> (i32, i32, i32, i32) {
    %c0_i32 = arith.constant 0 : i32
    %c0_i32_0 = arith.constant 0 : i32
    %c0_i32_1 = arith.constant 0 : i32
    %c0_i32_2 = arith.constant 0 : i32
    return %arg0, %c0_i32, %c0_i32_0, %c0_i32_1 : i32, i32, i32, i32
  }
  func.func @transform_4(%arg0: i32, %arg1: i32, %arg2: i32) -> (i32, i32, i32, i32) {
    %c0_i32 = arith.constant 0 : i32
    %c0_i32_0 = arith.constant 0 : i32
    return %arg0, %arg2, %c0_i32, %arg1 : i32, i32, i32, i32
  }
}

</mosaic_0001>

<bundles_post_ra>
// kernel: tpu_custom_call.1
= control target key start
LH: loop header
LB: loop body
LE: loop exit
PB: predicated region body
PF: predicated region fallthrough
CT: control target
= control target key end

     0   :  { %9 = vsyncpa [#allocation4], 0  ;;  %s3508_s0 = inlined_call_operand.vmem [shape: bf16[36,128], index: 0, kind: input, shape index: {}]   ;;  %s3509_s1 = inlined_call_operand.vmem [shape: f32[1,128], index: 1, kind: input, shape index: {}]   ;;  %s3510_s2 = inlined_call_operand.vmem [shape: f32[1,128], index: 2, kind: input, shape index: {}]   ;;  %s3511_s3 = inlined_call_operand.vmem [shape: bf16[2,18,18,4], index: 3, kind: input, shape index: {}]   ;;  %s3512_s4 = inlined_call_operand.hbm [shape: f32[2,16,16,128], index: 4, kind: output, shape index: {}]  }
   0x1   :  { %11 = vsyncpa [#allocation4 + $0x1], 0  ;;  %s2294_s15 = smov 0   ;;  %s2296_s16 = smov 0  }
   0x2   :  { %s2298_s17 = smov 0   ;;  %s2300_s18 = smov 0  }
   0x3   :  { %s2302_s1 = smov 0   ;;  %s2304_s19 = smov 0  }
   0x4 LB: > { %s1956_s2 = sadd.s32 4294967295, %s2258_s19   ;;  %s1957_s20 = sadd.s32 4294967294, %s2258_s19   ;;  %s2258_s19 = sphi %s2304_s19, %s17_s19   ;;  %s2254_s1 = sphi %s2302_s1, %s3578_s1   ;;  %s2250_s18 = sphi %s2300_s18, %s3577_s18   ;;  %s2246_s17 = sphi %s2298_s17, %s3576_s17   ;;  %s2242_s16 = sphi %s2296_s16, %s3575_s16   ;;  %s2238_s15 = sphi %s2294_s15, %s3574_s15  }
   0x5   : > { %s36_s21 = sadd.s32 1, %s2254_s1  ;;  %s151_s22 = sadd.s32 1, %s2246_s17 }
   0x6   : > { %p38_p0 = scmp.ge.s32.totalorder %s36_s21, 2  ;;  %p161_p1 = scmp.ne.s32.totalorder %s2246_s17, %s2242_s16 }
   0x7   : > { %p162_p2 = scmp.eq.s32.totalorder %s1956_s2, 1  ;;  %p167_p3 = scmp.ne.s32.totalorder %s2242_s16, %s2238_s15 }
   0x8   : > { %s3580_s21 = smov (%p38_p0, %s36_s21), 0  ;;  %p168_p5 = scmp.eq.s32.totalorder %s1957_s20, 1 }
   0x9   : > { %p2334_p4 = por %p162_p2, %p161_p1  ;;  %s144_s24 = ssub.s32 %s2254_s1, %s3580_s21 }
   0xa   : > { %p1963_p6 = scmp.ge.s32.totalorder %s2258_s19, 1  ;;  %p149_p7 = scmp.eq.s32.totalorder %s144_s24, 0 }
   0xb   : > { %p2341_p8 = por %p168_p5, %p167_p3  ;;  %p213_p9 = scmp.lt.s32.totalorder %s2258_s19, 3 }
   0xc   : > { %s2347_s26 = scalar_select %p149_p7, %s2246_s17, %s151_s22  }
   0xd   : > { %p214_p10 = pnand %p1963_p6, %p213_p9 }
   0xf   : > { %217 = sbr.rel (%p214_p10) target bundleno = 667 (0x29b), region = 36 }
  0x14   : > { %p259_p11 = scmp.lt.s32.totalorder %s2250_s18, 1  ;;  %vm324_vm0 = vsmask.f32 3328  ;;  %vm325_vm1 = vsmask.f32 7440  ;;  %s2260_s6 = smov 4  }
  0x15   : > { %vm2392_vm2 = vmor %vm324_vm0, %vm325_vm1  ;;  %vm759_vm3 = vcmask 1042432   ;;  %vm760_vm4 = vcmask 1046532   ;;  %s2261_s7 = smov 8   ;;  %s2262_s8 = smov 12   ;;  %vm1360_vm6 = vcmask 31744   ;;  %vm1409_vm7 = vcmask 64512  }
  0x16   : > { %s260_s27 = scalar_select %p259_p11, %s2250_s18, 1  ;;  %vm2679_vm5 = vmor %vm759_vm3, %vm760_vm4  ;;  %vm1442_vm8 = vcmask 97280   ;;  %vm1475_vm9 = vcmask 130048   ;;  %vm1693_vm10 = vcmask 1041408   ;;  %vm1508_vm11 = vcmask 162816  }
  0x17   : > { %s2263_s9 = smov 16   ;;  %s2264_s10 = smov 20   ;;  %vm1541_vm12 = vcmask 195584   ;;  %vm1574_vm13 = vcmask 228352   ;;  %vm1607_vm14 = vcmask 261120   ;;  %vm1660_vm15 = vcmask 293888  }
  0x18   : > { %s2115_s28 = smul.u32 216, %s260_s27  ;;  %s2265_s11 = smov 24  }
  0x19   : > { %s2266_s12 = smov 32   ;;  %s2267_s13 = smov 28  }
  0x1a   : > { %s2354_s5 = scalar_lea.vmem %s3511_s3, %s2115_s28  ;;  %s246_s28 = sand.u32 1, %s2242_s16  }
  0x1b   : > { %v2357_v0 = vld [vmem:[%s2354_s5 + $0x30] sm:$0xf]  ;;  %v2360_v1 = vld [vmem:[%s2354_s5 + $0x34] sm:$0xf]  ;;  %v2363_v2 = vld [vmem:[%s2354_s5 + $0x38] sm:$0x1] }
  0x1c   : > { %v424_v3 = vshrl.u32 %v2357_v0, 16  ;;  %v427_v4 = vshll.u32 %v2357_v0, 16  ;;  %v433_v5 = vshll.u32 %v2360_v1, 16  ;;  %v437_v6 = vshrl.u32 %v2360_v1, 16  ;;  %v2370_v7 = vld [vmem:[%s2354_s5 + $0x18] sm:$0xf] }
  0x1d   : > { %v443_v8 = vshll.u32 %v2363_v2, 16  ;;  %v2374_v9 = vld [vmem:[%s2354_s5 + $0x1c] sm:$0xf]  ;;  %v2377_v10 = vld [vmem:[%s2354_s5 + $0x20] sm:$0x1]  ;;  %v376_v11 = vshrl.u32 %v2370_v7, 16 }
  0x1e   : > { %v426_v12 = vrot.slane %v424_v3, 4  ;;  %v429_v13 = vrot.slane %v427_v4, 5  ;;  %v435_v14 = vrot.slane %v433_v5, 5  ;;  %v439_v15 = vrot.slane %v437_v6, 4  ;;  %v2381_v16 = vld [vmem:[%s2354_s5] sm:$0xf] }
  0x1f   : > { %v445_v17 = vrot.slane %v443_v8, 5  ;;  %v378_v18 = vrot.slane %v376_v11, 4  ;;  %v379_v19 = vshll.u32 %v2370_v7, 16  ;;  %v385_v20 = vshll.u32 %v2374_v9, 16  ;;  %v2388_v25 = vld [vmem:[%s2354_s5 + $0x4] sm:$0xf] }
  0x20   : > { %v430_v21 = vor.u32 %v429_v13, %v426_v12  ;;  %v440_v22 = vor.u32 %v439_v15, %v435_v14  ;;  %v389_v23 = vshrl.u32 %v2374_v9, 16  ;;  %v395_v24 = vshll.u32 %v2377_v10, 16  ;;  %v2399_v36 = vld [vmem:[%s2354_s5 + $0x8] sm:$0x1]  ;;  %v2408_v44 = vld [vmem:[%s2354_s5 + $0x3c] sm:$0xf] }
  0x21   : > { %v381_v27 = vrot.slane %v379_v19, 5  ;;  %v387_v28 = vrot.slane %v385_v20, 5  ;;  %v328_v29 = vshrl.u32 %v2381_v16, 16  ;;  %v331_v30 = vshll.u32 %v2381_v16, 16  ;;  %v2416_v56 = vld [vmem:[%s2354_s5 + $0x40] sm:$0xf] }
  0x22   : > { %v431_v31 = vrot.slane %v430_v21, 4  ;;  %v441_v32 = vrot.slane %v440_v22, 4  ;;  %v391_v33 = vrot.slane %v389_v23, 4  ;;  %v397_v34 = vrot.slane %v395_v24, 5  ;;  %v2422_v62 = vld [vmem:[%s2354_s5 + $0x44] sm:$0x1] }
  0x23   : > { %v382_v35 = vor.u32 %v381_v27, %v378_v18  ;;  %v330_v37 = vrot.slane %v328_v29, 4  ;;  %v333_v38 = vrot.slane %v331_v30, 5  ;;  %v337_v39 = vshll.u32 %v2388_v25, 16  ;;  %v2425_v63 = vld [vmem:[%s2354_s5 + $0x24] sm:$0xf]  ;;  %s1964_s29 = sshll.u32 %s246_s28, 8 }
  0x24   : > { %v436_v40 = vsel %vm2392_vm2, %v431_v31, %v435_v14  ;;  %v446_v41 = vsel %vm2392_vm2, %v441_v32, %v445_v17  ;;  %v392_v42 = vor.u32 %v391_v33, %v387_v28  ;;  %v341_v43 = vshrl.u32 %v2388_v25, 16  ;;  %v2435_v14 = vld [vmem:[%s2354_s5 + $0x28] sm:$0xf]  ;;  %v2441_v19 = vld [vmem:[%s2354_s5 + $0x2c] sm:$0x1]  ;;  %s3406_s30 = scalar_lea.vmem [#allocation3], %s1964_s29 }
  0x25   : > { %v998_v45 = vunpack.c.l.b16 %v436_v40  ;;  %v999_v46 = vunpack.c.l.b16 %v446_v41  ;;  %v383_v47 = vrot.slane %v382_v35, 4  ;;  %v334_v48 = vor.u32 %v333_v38, %v330_v37  ;;  %v2448_v27 = vld [vmem:[%s2354_s5 + $0xc] sm:$0xf]  ;;  %v2456_v40 = vld [vmem:[%s2354_s5 + $0x10] sm:$0xf]  ;;  %s2200_s20 = scalar_lea.hbm %s3512_s4, 512 }
  0x26   : > { %v393_v49 = vrot.slane %v392_v42, 4  ;;  %v339_v50 = vrot.slane %v337_v39, 5  ;;  %v343_v51 = vrot.slane %v341_v43, 4  ;;  %v347_v52 = vshll.u32 %v2399_v36, 16 }
  0x27   : > { %v2411_v53 = vpack.c.b16 %v999_v46, %v998_v45  ;;  %v388_v54 = vsel %vm2392_vm2, %v383_v47, %v387_v28  ;;  %v335_v55 = vrot.slane %v334_v48, 4  ;;  %v448_v57 = vshrl.u32 %v2408_v44, 16  ;;  %v2460_v47 = vld [vmem:[%s2354_s5 + $0x14] sm:$0x1] }
  0x28   : > { %v398_v58 = vsel %vm2392_vm2, %v393_v49, %v397_v34  ;;  %v994_v59 = vunpack.c.l.b16 %v388_v54  ;;  %v344_v60 = vor.u32 %v343_v51, %v339_v50  ;;  %v349_v61 = vrot.slane %v347_v52, 5  ;;  %v2467_v52 = vld [vmem:[%s2354_s5 + $0x60] sm:$0xf] }
  0x29   : > { %3542 = vst [vmem:[#allocation6_spill] sm:$0xff] %v2411_v53  ;;  %1046 = vrot.lane.b32.xlu2 %v2411_v53, %s2260_s6  ;;  %v995_v3 = vunpack.c.l.b16 %v398_v58  ;;  %v340_v4 = vsel %vm2392_vm2, %v335_v55, %v339_v50  ;;  %v450_v5 = vrot.slane %v448_v57, 4  ;;  %v451_v6 = vshll.u32 %v2408_v44, 16  ;;  %v2593_v53 = vld [vmem:[%s2354_s5 + $0x74] sm:$0x1] }
  0x2a   : > { %v345_v8 = vrot.slane %v344_v60, 4  ;;  %v990_v11 = vunpack.c.l.b16 %v340_v4  ;;  %v457_v12 = vshll.u32 %v2416_v56, 16  ;;  %v461_v13 = vshrl.u32 %v2416_v56, 16 }
  0x2b   : > { %v2437_v15 = vpack.c.b16 %v995_v3, %v994_v59  ;;  %v453_v17 = vrot.slane %v451_v6, 5  ;;  %v467_v18 = vshll.u32 %v2422_v62, 16  ;;  %v400_v20 = vshrl.u32 %v2425_v63, 16 }
  0x2c   : > { %v350_v21 = vsel %vm2392_vm2, %v345_v8, %v349_v61  ;;  %v459_v22 = vrot.slane %v457_v12, 5  ;;  %v463_v23 = vrot.slane %v461_v13, 4  ;;  %v403_v24 = vshll.u32 %v2425_v63, 16  ;;  %v2477_v8 = vld [vmem:[%s2354_s5 + $0x64] sm:$0xf] }
  0x2d   : > { %3543 = vst [vmem:[#allocation7_spill] sm:$0xff] %v2437_v15  ;;  %1042 = vrot.lane.b32.xlu1 %v2437_v15, %s2260_s6  ;;  %v991_v28 = vunpack.c.l.b16 %v350_v21  ;;  %v454_v29 = vor.u32 %v453_v17, %v450_v5  ;;  %v469_v30 = vrot.slane %v467_v18, 5  ;;  %v402_v31 = vrot.slane %v400_v20, 4  ;;  %v2483_v20 = vld [vmem:[%s2354_s5 + $0x68] sm:$0x1] }
  0x2e   : > { %v464_v32 = vor.u32 %v463_v23, %v459_v22  ;;  %v405_v33 = vrot.slane %v403_v24, 5  ;;  %v409_v34 = vshll.u32 %v2435_v14, 16  ;;  %v413_v35 = vshrl.u32 %v2435_v14, 16  ;;  %v2486_v21 = vld [vmem:[%s2354_s5 + $0x54] sm:$0xf] }
  0x2f   : > { %v1022_v37 = vpack.c.b16 %v991_v28, %v990_v11  ;;  %v455_v38 = vrot.slane %v454_v29, 4  ;;  %v419_v39 = vshll.u32 %v2441_v19, 16  ;;  %v352_v41 = vshrl.u32 %v2448_v27, 16 }
  0x30   : > { %v465_v42 = vrot.slane %v464_v32, 4  ;;  %v406_v43 = vor.u32 %v405_v33, %v402_v31  ;;  %v411_v45 = vrot.slane %v409_v34, 5  ;;  %v415_v46 = vrot.slane %v413_v35, 4 }
  0x31   : > { %1038 = vrot.lane.b32.xlu0 %v1022_v37, %s2260_s6  ;;  %v460_v48 = vsel %vm2392_vm2, %v455_v38, %v459_v22  ;;  %v421_v49 = vrot.slane %v419_v39, 5  ;;  %v354_v50 = vrot.slane %v352_v41, 4  ;;  %v355_v51 = vshll.u32 %v2448_v27, 16  ;;  %v2497_v37 = vld [vmem:[%s2354_s5 + $0x58] sm:$0xf] }
  0x32   : > { %v470_v54 = vsel %vm2392_vm2, %v465_v42, %v469_v30  ;;  %v1000_v55 = vunpack.c.l.b16 %v460_v48  ;;  %v407_v57 = vrot.slane %v406_v43, 4  ;;  %v416_v58 = vor.u32 %v415_v46, %v411_v45 }
  0x33   : > { %v1001_v59 = vunpack.c.l.b16 %v470_v54  ;;  %v357_v60 = vrot.slane %v355_v51, 5  ;;  %v361_v61 = vshll.u32 %v2456_v40, 16  ;;  %v365_v3 = vshrl.u32 %v2456_v40, 16 }
  0x34   : > { %v412_v4 = vsel %vm2392_vm2, %v407_v57, %v411_v45  ;;  %v417_v5 = vrot.slane %v416_v58, 4  ;;  %v371_v6 = vshll.u32 %v2460_v47, 16  ;;  %v520_v11 = vshrl.u32 %v2467_v52, 16  ;;  %v2505_v45 = vld [vmem:[%s2354_s5 + $0x5c] sm:$0x1] }
  0x35   : > { %v2480_v12 = vpack.c.b16 %v1001_v59, %v1000_v55  ;;  %v996_v13 = vunpack.c.l.b16 %v412_v4  ;;  %v358_v17 = vor.u32 %v357_v60, %v354_v50  ;;  %v363_v18 = vrot.slane %v361_v61, 5  ;;  %v2512_v58 = vld [vmem:[%s2354_s5 + $0x48] sm:$0xf] }
  0x36   : > { %v422_v22 = vsel %vm2392_vm2, %v417_v5, %v421_v49  ;;  %v367_v23 = vrot.slane %v365_v3, 4  ;;  %v373_v24 = vrot.slane %v371_v6, 5  ;;  %v522_v28 = vrot.slane %v520_v11, 4 }
  0x37   : > { %3544 = vst [vmem:[#allocation8_spill] sm:$0xff] %v2480_v12  ;;  %1048 = vrot.lane.b32.xlu2 %v2480_v12, %s2260_s6  ;;  %v997_v29 = vunpack.c.l.b16 %v422_v22  ;;  %v359_v30 = vrot.slane %v358_v17, 4  ;;  %v523_v31 = vshll.u32 %v2467_v52, 16  ;;  %v529_v32 = vshll.u32 %v2477_v8, 16  ;;  %v2519_v22 = vld [vmem:[%s2354_s5 + $0x4c] sm:$0xf] }
  0x38   : > { %v368_v33 = vor.u32 %v367_v23, %v363_v18  ;;  %v533_v34 = vshrl.u32 %v2477_v8, 16  ;;  %v539_v35 = vshll.u32 %v2483_v20, 16  ;;  %v496_v38 = vshrl.u32 %v2486_v21, 16  ;;  %v2620_v12 = vld [vmem:[%s2354_s5 + $0x9c] sm:$0xf] }
  0x39   : > { %v2500_v39 = vpack.c.b16 %v997_v29, %v996_v13  ;;  %v364_v41 = vsel %vm2392_vm2, %v359_v30, %v363_v18  ;;  %v525_v42 = vrot.slane %v523_v31, 5  ;;  %v531_v43 = vrot.slane %v529_v32, 5  ;;  %v2527_v30 = vld [vmem:[%s2354_s5 + $0x50] sm:$0x1]  ;;  %v2531_v32 = vld [vmem:[%s2354_s5 + $0x84] sm:$0xf] }
  0x3a   : > { %v369_v46 = vrot.slane %v368_v33, 4  ;;  %v992_v48 = vunpack.c.l.b16 %v364_v41  ;;  %v535_v49 = vrot.slane %v533_v34, 4  ;;  %v541_v50 = vrot.slane %v539_v35, 5 }
  0x3b   : > { %3545 = vst [vmem:[#allocation9_spill] sm:$0xff] %v2500_v39  ;;  %1044 = vrot.lane.b32.xlu1 %v2500_v39, %s2260_s6  ;;  %v526_v51 = vor.u32 %v525_v42, %v522_v28  ;;  %v498_v54 = vrot.slane %v496_v38, 4  ;;  %v499_v55 = vshll.u32 %v2486_v21, 16  ;;  %v505_v57 = vshll.u32 %v2497_v37, 16  ;;  %v2639_v39 = vld [vmem:[%s2354_s5 + $0xa4] sm:$0x1] }
  0x3c   : > { %v374_v59 = vsel %vm2392_vm2, %v369_v46, %v373_v24  ;;  %v536_v60 = vor.u32 %v535_v49, %v531_v43  ;;  %v509_v61 = vshrl.u32 %v2497_v37, 16  ;;  %v515_v3 = vshll.u32 %v2505_v45, 16 }
  0x3d   : > { %v993_v4 = vunpack.c.l.b16 %v374_v59  ;;  %v527_v5 = vrot.slane %v526_v51, 4  ;;  %v501_v6 = vrot.slane %v499_v55, 5  ;;  %v507_v11 = vrot.slane %v505_v57, 5 }
  0x3e   : > { %v537_v13 = vrot.slane %v536_v60, 4  ;;  %v511_v17 = vrot.slane %v509_v61, 4  ;;  %v517_v18 = vrot.slane %v515_v3, 5  ;;  %v472_v23 = vshrl.u32 %v2512_v58, 16  ;;  %v2546_v60 = vld [vmem:[%s2354_s5 + $0x88] sm:$0xf] }
  0x3f   : > { %v2522_v28 = vpack.c.b16 %v993_v4, %v992_v48  ;;  %v532_v24 = vsel %vm2392_vm2, %v527_v5, %v531_v43  ;;  %v502_v29 = vor.u32 %v501_v6, %v498_v54  ;;  %v475_v31 = vshll.u32 %v2512_v58, 16  ;;  %v2549_v61 = vld [vmem:[%s2354_s5 + $0x8c] sm:$0x1] }
  0x40   : > { %v542_v33 = vsel %vm2392_vm2, %v537_v13, %v541_v50  ;;  %v1006_v34 = vunpack.c.l.b16 %v532_v24  ;;  %v512_v35 = vor.u32 %v511_v17, %v507_v11  ;;  %v474_v38 = vrot.slane %v472_v23, 4  ;;  %3548 = vst [vmem:[#allocation12_spill] sm:$0xff] %v2549_v61  ;;  %v2554_v13 = vld [vmem:[%s2354_s5 + $0x78] sm:$0xf] }
  0x41   : > { %3546 = vst [vmem:[#allocation10_spill] sm:$0xff] %v2522_v28  ;;  %1040 = vrot.lane.b32.xlu0 %v2522_v28, %s2260_s6  ;;  %v1007_v41 = vunpack.c.l.b16 %v542_v33  ;;  %v503_v42 = vrot.slane %v502_v29, 4  ;;  %v477_v43 = vrot.slane %v475_v31, 5  ;;  %v481_v46 = vshll.u32 %v2519_v22, 16  ;;  %v2631_v28 = vld [vmem:[%s2354_s5 + $0xa0] sm:$0xf] }
  0x42   : > { %v513_v48 = vrot.slane %v512_v35, 4  ;;  %v485_v49 = vshrl.u32 %v2519_v22, 16  ;;  %v491_v51 = vshll.u32 %v2527_v30, 16  ;;  %v592_v50 = vshrl.u32 %v2531_v32, 16 }
  0x43   : > { %v2541_v54 = vpack.c.b16 %v1007_v41, %v1006_v34  ;;  %v508_v55 = vsel %vm2392_vm2, %v503_v42, %v507_v11  ;;  %v478_v57 = vor.u32 %v477_v43, %v474_v38  ;;  %v483_v59 = vrot.slane %v481_v46, 5  ;;  %v2567_v41 = vld [vmem:[%s2354_s5 + $0x7c] sm:$0xf] }
  0x44   : > { %v518_v3 = vsel %vm2392_vm2, %v513_v48, %v517_v18  ;;  %v1004_v4 = vunpack.c.l.b16 %v508_v55  ;;  %v487_v5 = vrot.slane %v485_v49, 4  ;;  %v493_v6 = vrot.slane %v491_v51, 5  ;;  %v2571_v51 = vld [vmem:[%s2354_s5 + $0x80] sm:$0x1] }
  0x45   : > { %3547 = vst [vmem:[#allocation11_spill] sm:$0xff] %v2541_v54  ;;  %1054 = vrot.lane.b32.xlu2 %v2541_v54, %s2260_s6  ;;  %v1005_v17 = vunpack.c.l.b16 %v518_v3  ;;  %v479_v11 = vrot.slane %v478_v57, 4  ;;  %v594_v23 = vrot.slane %v592_v50, 4  ;;  %v595_v24 = vshll.u32 %v2531_v32, 16  ;;  %v2577_v3 = vld [vmem:[%s2354_s5 + $0x6c] sm:$0xf] }
  0x46   : > { %v488_v29 = vor.u32 %v487_v5, %v483_v59  ;;  %v601_v31 = vshll.u32 %v2546_v60, 16  ;;  %v605_v18 = vshrl.u32 %v2546_v60, 16  ;;  %v611_v33 = vshll.u32 %v2549_v61, 16 }
  0x47   : > { %v2562_v34 = vpack.c.b16 %v1005_v17, %v1004_v4  ;;  %v484_v35 = vsel %vm2392_vm2, %v479_v11, %v483_v59  ;;  %v597_v38 = vrot.slane %v595_v24, 5  ;;  %v568_v42 = vshrl.u32 %v2554_v13, 16 }
  0x48   : > { %v489_v43 = vrot.slane %v488_v29, 4  ;;  %v1002_v46 = vunpack.c.l.b16 %v484_v35  ;;  %v603_v48 = vrot.slane %v601_v31, 5  ;;  %v607_v49 = vrot.slane %v605_v18, 4 }
  0x49   : > { %3549 = vst [vmem:[#allocation13_spill] sm:$0xff] %v2562_v34  ;;  %1052 = vrot.lane.b32.xlu1 %v2562_v34, %s2260_s6  ;;  %v598_v50 = vor.u32 %v597_v38, %v594_v23  ;;  %v613_v55 = vrot.slane %v611_v33, 5  ;;  %v570_v57 = vrot.slane %v568_v42, 4  ;;  %v571_v59 = vshll.u32 %v2554_v13, 16  ;;  %v2585_v38 = vld [vmem:[%s2354_s5 + $0x70] sm:$0xf] }
  0x4a   : > { %v494_v4 = vsel %vm2392_vm2, %v489_v43, %v493_v6  ;;  %v608_v5 = vor.u32 %v607_v49, %v603_v48  ;;  %v577_v17 = vshll.u32 %v2567_v41, 16  ;;  %v581_v11 = vshrl.u32 %v2567_v41, 16 }
  0x4b   : > { %v1003_v24 = vunpack.c.l.b16 %v494_v4  ;;  %v599_v29 = vrot.slane %v598_v50, 4  ;;  %v573_v23 = vrot.slane %v571_v59, 5  ;;  %v587_v31 = vshll.u32 %v2571_v51, 16  ;;  %v2596_v50 = vld [vmem:[%s2354_s5 + $0xa8] sm:$0xf] }
  0x4c   : > { %v609_v18 = vrot.slane %v608_v5, 4  ;;  %v579_v33 = vrot.slane %v577_v17, 5  ;;  %v583_v35 = vrot.slane %v581_v11, 4  ;;  %v544_v42 = vshrl.u32 %v2577_v3, 16  ;;  %3551 = vst [vmem:[#allocation15_spill] sm:$0xff] %v2596_v50 }
  0x4d   : > { %v2588_v6 = vpack.c.b16 %v1003_v24, %v1002_v46  ;;  %v604_v43 = vsel %vm2392_vm2, %v599_v29, %v603_v48  ;;  %v574_v49 = vor.u32 %v573_v23, %v570_v57  ;;  %v589_v54 = vrot.slane %v587_v31, 5 }
  0x4e   : > { %v614_v59 = vsel %vm2392_vm2, %v609_v18, %v613_v55  ;;  %v1012_v4 = vunpack.c.l.b16 %v604_v43  ;;  %v584_v5 = vor.u32 %v583_v35, %v579_v33  ;;  %v546_v17 = vrot.slane %v544_v42, 4  ;;  %v2612_v43 = vld [vmem:[%s2354_s5 + $0xac] sm:$0xf] }
  0x4f   : > { %3550 = vst [vmem:[#allocation14_spill] sm:$0xff] %v2588_v6  ;;  %1050 = vrot.lane.b32.xlu0 %v2588_v6, %s2260_s6  ;;  %v1013_v46 = vunpack.c.l.b16 %v614_v59  ;;  %v575_v11 = vrot.slane %v574_v49, 4  ;;  %v547_v48 = vshll.u32 %v2577_v3, 16  ;;  %v553_v57 = vshll.u32 %v2585_v38, 16  ;;  %v2615_v49 = vld [vmem:[%s2354_s5 + $0xb0] sm:$0x1] }
  0x50   : > { %v585_v24 = vrot.slane %v584_v5, 4  ;;  %v557_v29 = vshrl.u32 %v2585_v38, 16  ;;  %v563_v55 = vshll.u32 %v2593_v53, 16  ;;  %v664_v23 = vshrl.u32 %v2596_v50, 16  ;;  %3553 = vst [vmem:[#allocation17_spill] sm:$0xff] %v2612_v43 }
  0x51   : > { %v2607_v31 = vpack.c.b16 %v1013_v46, %v1012_v4  ;;  %v580_v18 = vsel %vm2392_vm2, %v575_v11, %v579_v33  ;;  %v549_v35 = vrot.slane %v547_v48, 5  ;;  %v555_v42 = vrot.slane %v553_v57, 5  ;;  %3554 = vst [vmem:[#allocation18_spill] sm:$0xff] %v2615_v49 }
  0x52   : > { %v590_v59 = vsel %vm2392_vm2, %v585_v24, %v589_v54  ;;  %v1010_v5 = vunpack.c.l.b16 %v580_v18  ;;  %v559_v34 = vrot.slane %v557_v29, 4  ;;  %v565_v6 = vrot.slane %v563_v55, 5 }
  0x53   : > { %3552 = vst [vmem:[#allocation16_spill] sm:$0xff] %v2607_v31  ;;  %1060 = vrot.lane.b32.xlu2 %v2607_v31, %s2260_s6  ;;  %v1011_v4 = vunpack.c.l.b16 %v590_v59  ;;  %v550_v33 = vor.u32 %v549_v35, %v546_v17  ;;  %v666_v46 = vrot.slane %v664_v23, 4  ;;  %v667_v11 = vshll.u32 %v2596_v50, 16 }
  0x54   : > { %v560_v48 = vor.u32 %v559_v34, %v555_v42  ;;  %v673_v57 = vshll.u32 %v2612_v43, 16  ;;  %v677_v54 = vshrl.u32 %v2612_v43, 16  ;;  %v683_v24 = vshll.u32 %v2615_v49, 16 }
  0x55   : > { %v2628_v29 = vpack.c.b16 %v1011_v4, %v1010_v5  ;;  %v551_v55 = vrot.slane %v550_v33, 4  ;;  %v669_v18 = vrot.slane %v667_v11, 5  ;;  %v640_v17 = vshrl.u32 %v2620_v12, 16  ;;  %v2643_v33 = vld [vmem:[%s2354_s5 + $0x90] sm:$0xf] }
  0x56   : > { %v561_v23 = vrot.slane %v560_v48, 4  ;;  %v675_v35 = vrot.slane %v673_v57, 5  ;;  %v679_v59 = vrot.slane %v677_v54, 4  ;;  %v685_v34 = vrot.slane %v683_v24, 5 }
  0x57   : > { %3555 = vst [vmem:[#allocation19_spill] sm:$0xff] %v2628_v29  ;;  %1058 = vrot.lane.b32.xlu1 %v2628_v29, %s2260_s6  ;;  %v556_v31 = vsel %vm2392_vm2, %v551_v55, %v555_v42  ;;  %v670_v15 = vor.u32 %v669_v18, %v666_v46  ;;  %v642_v5 = vrot.slane %v640_v17, 4  ;;  %v643_v4 = vshll.u32 %v2620_v12, 16 }
  0x58   : > { %v566_v11 = vsel %vm2392_vm2, %v561_v23, %v565_v6  ;;  %v1008_v48 = vunpack.c.l.b16 %v556_v31  ;;  %v680_v57 = vor.u32 %v679_v59, %v675_v35  ;;  %v649_v54 = vshll.u32 %v2631_v28, 16  ;;  %v2656_v59 = vld [vmem:[%s2354_s5 + $0x94] sm:$0xf] }
  0x59   : > { %v1009_v24 = vunpack.c.l.b16 %v566_v11  ;;  %v671_v29 = vrot.slane %v670_v15, 4  ;;  %v645_v42 = vrot.slane %v643_v4, 5  ;;  %v653_v46 = vshrl.u32 %v2631_v28, 16  ;;  %v2659_v11 = vld [vmem:[%s2354_s5 + $0x98] sm:$0x1] }
  0x5a   : > { %v681_v55 = vrot.slane %v680_v57, 4  ;;  %v651_v18 = vrot.slane %v649_v54, 5  ;;  %v659_v17 = vshll.u32 %v2639_v39, 16  ;;  %v616_v49 = vshrl.u32 %v2643_v33, 16 }
  0x5b   : > { %v2651_v43 = vpack.c.b16 %v1009_v24, %v1008_v48  ;;  %v676_v6 = vsel %vm2392_vm2, %v671_v29, %v675_v35  ;;  %v646_v31 = vor.u32 %v645_v42, %v642_v5  ;;  %v655_v23 = vrot.slane %v653_v46, 4 }
  0x5c   : > { %v686_v15 = vsel %vm2392_vm2, %v681_v55, %v685_v34  ;;  %v1018_v4 = vunpack.c.l.b16 %v676_v6  ;;  %v661_v57 = vrot.slane %v659_v17, 5  ;;  %v618_v54 = vrot.slane %v616_v49, 4 }
  0x5d   : > { %3556 = vst [vmem:[#allocation20_spill] sm:$0xff] %v2651_v43  ;;  %1056 = vrot.lane.b32.xlu0 %v2651_v43, %s2260_s6  ;;  %v1019_v48 = vunpack.c.l.b16 %v686_v15  ;;  %v647_v24 = vrot.slane %v646_v31, 4  ;;  %v656_v50 = vor.u32 %v655_v23, %v651_v18  ;;  %v619_v29 = vshll.u32 %v2643_v33, 16 }
  0x5e   : > { %v625_v35 = vshll.u32 %v2656_v59, 16  ;;  %v629_v5 = vshrl.u32 %v2656_v59, 16  ;;  %v635_v42 = vshll.u32 %v2659_v11, 16 }
  0x5f   : > { %v2669_v46 = vpack.c.b16 %v1019_v48, %v1018_v4  ;;  %v652_v49 = vsel %vm2392_vm2, %v647_v24, %v651_v18  ;;  %v657_v34 = vrot.slane %v656_v50, 4  ;;  %v621_v55 = vrot.slane %v619_v29, 5 }
  0x60   : > { %v1016_v17 = vunpack.c.l.b16 %v652_v49  ;;  %v627_v6 = vrot.slane %v625_v35, 5  ;;  %v631_v31 = vrot.slane %v629_v5, 4  ;;  %v637_v23 = vrot.slane %v635_v42, 5 }
  0x61   : > { %1066 = vrot.lane.b32.xlu2 %v2669_v46, %s2260_s6  ;;  %v662_v15 = vsel %vm2392_vm2, %v657_v34, %v661_v57  ;;  %v622_v43 = vor.u32 %v621_v55, %v618_v54  ;;  %v1967_v4 = vrot.slane %v2448_v27, 9  ;;  %v771_v18 = vrot.slane %v2456_v40, 5  ;;  %v2693_v34 = vld [vmem:[%s2354_s5 + $0xb4] sm:$0xf] }
  0x62   : > { %v1017_v48 = vunpack.c.l.b16 %v662_v15  ;;  %v632_v61 = vor.u32 %v631_v31, %v627_v6  ;;  %v774_v24 = vrot.slane %v2460_v47, 5  ;;  %v1966_v57 = vrot.slane %v2381_v16, 9  ;;  %v2709_v31 = vld [vmem:[%s2354_s5 + $0xbc] sm:$0x1] }
  0x63   : > { %v623_v29 = vrot.slane %v622_v43, 4  ;;  %v764_v54 = vrot.slane %v2388_v25, 5  ;;  %v767_v35 = vrot.slane %v2399_v36, 5  ;;  %v772_v42 = vsel %vm2679_vm5, %v1967_v4, %v771_v18  ;;  %v2700_v43 = vld [vmem:[%s2354_s5 + $0xb8] sm:$0xf] }
  0x64   : > { %v2688_v27 = vpack.c.b16 %v1017_v48, %v1016_v17  ;;  %v633_v5 = vrot.slane %v632_v61, 4  ;;  %v773_v49 = vrot.slane %v771_v18, 4  ;;  %v1072_v47 = vunpack.c.l.b16 %v772_v42 }
  0x65   : > { %v628_v40 = vsel %vm2392_vm2, %v623_v29, %v627_v6  ;;  %v765_v16 = vsel %vm2679_vm5, %v1966_v57, %v764_v54  ;;  %v766_v25 = vrot.slane %v764_v54, 4  ;;  %v688_v48 = vshrl.u32 %v2693_v34, 16 }
  0x66   : > { %1064 = vrot.lane.b32.xlu1 %v2688_v27, %s2260_s6  ;;  %v638_v36 = vsel %vm2392_vm2, %v633_v5, %v637_v23  ;;  %v1014_v61 = vunpack.c.l.b16 %v628_v40  ;;  %v775_v55 = vsel %vm2679_vm5, %v773_v49, %v774_v24  ;;  %v1070_v17 = vunpack.c.l.b16 %v765_v16 }
  0x67   : > { %v1015_v6 = vunpack.c.l.b16 %v638_v36  ;;  %v1073_v15 = vunpack.c.l.b16 %v775_v55  ;;  %v768_v4 = vsel %vm2679_vm5, %v766_v25, %v767_v35  ;;  %v691_v29 = vshll.u32 %v2693_v34, 16 }
  0x68   : > { %v1071_v18 = vunpack.c.l.b16 %v768_v4  ;;  %v697_v57 = vshll.u32 %v2700_v43, 16  ;;  %v701_v23 = vshrl.u32 %v2700_v43, 16  ;;  %v690_v5 = vrot.slane %v688_v48, 4 }
  0x69   : > { %v2717_v54 = vpack.c.b16 %v1015_v6, %v1014_v61  ;;  %v2719_v24 = vpack.c.b16 %v1073_v15, %v1072_v47  ;;  %v707_v42 = vshll.u32 %v2709_v31, 16  ;;  %v693_v40 = vrot.slane %v691_v29, 5 }
  0x6a   : > { %v1102_v49 = vpack.c.b16 %v1071_v18, %v1070_v17  ;;  %v699_v16 = vrot.slane %v697_v57, 5  ;;  %v703_v35 = vrot.slane %v701_v23, 4  ;;  %v1970_v36 = vrot.slane %v2357_v0, 9 }
  0x6b   : > { %1062 = vrot.lane.b32.xlu0 %v2717_v54, %s2260_s6  ;;  %1120 = vrot.lane.b32.xlu2 %v2719_v24, %s2261_s7  ;;  %v709_v25 = vrot.slane %v707_v42, 5  ;;  %v792_v47 = vrot.slane %v2360_v1, 5  ;;  %v795_v61 = vrot.slane %v2363_v2, 5  ;;  %v694_v55 = vor.u32 %v693_v40, %v690_v5 }
  0x6c   : > { %v704_v6 = vor.u32 %v703_v35, %v699_v16  ;;  %v1969_v17 = vrot.slane %v2425_v63, 9  ;;  %v785_v15 = vrot.slane %v2435_v14, 5  ;;  %v788_v18 = vrot.slane %v2441_v19, 5 }
  0x6d   : > { %v793_v4 = vsel %vm2679_vm5, %v1970_v36, %v792_v47  ;;  %v794_v48 = vrot.slane %v792_v47, 4  ;;  %v1968_v29 = vrot.slane %v2370_v7, 9  ;;  %v695_v0 = vrot.slane %v694_v55, 4 }
  0x6e   : > { %1118 = vrot.lane.b32.xlu1 %v1102_v49, %s2261_s7  ;;  %v705_v1 = vrot.slane %v704_v6, 4  ;;  %v1078_v57 = vunpack.c.l.b16 %v793_v4  ;;  %v786_v2 = vsel %vm2679_vm5, %v1969_v17, %v785_v15  ;;  %v787_v14 = vrot.slane %v785_v15, 4 }
  0x6f   : > { %v796_v63 = vsel %vm2679_vm5, %v794_v48, %v795_v61  ;;  %v1076_v23 = vunpack.c.l.b16 %v786_v2  ;;  %v778_v5 = vrot.slane %v2374_v9, 5  ;;  %v700_v19 = vsel %vm2392_vm2, %v695_v0, %v699_v16 }
  0x70   : > { %v710_v7 = vsel %vm2392_vm2, %v705_v1, %v709_v25  ;;  %v1079_v42 = vunpack.c.l.b16 %v796_v63  ;;  %v781_v49 = vrot.slane %v2377_v10, 5  ;;  %v1020_v40 = vunpack.c.l.b16 %v700_v19 }
  0x71   : > { %v1021_v35 = vunpack.c.l.b16 %v710_v7  ;;  %v789_v36 = vsel %vm2679_vm5, %v787_v14, %v788_v18  ;;  %v779_v47 = vsel %vm2679_vm5, %v1968_v29, %v778_v5  ;;  %v780_v55 = vrot.slane %v778_v5, 4 }
  0x72   : > { %v2750_v61 = vpack.c.b16 %v1079_v42, %v1078_v57  ;;  %v1077_v9 = vunpack.c.l.b16 %v789_v36  ;;  %v1074_v6 = vunpack.c.l.b16 %v779_v47  ;;  %v1973_v25 = vrot.slane %v2486_v21, 9 }
  0x73   : > { %v2752_v16 = vpack.c.b16 %v1021_v35, %v1020_v40  ;;  %v813_v17 = vrot.slane %v2497_v37, 5  ;;  %v816_v10 = vrot.slane %v2505_v45, 5  ;;  %v782_v4 = vsel %vm2679_vm5, %v780_v55, %v781_v49 }
  0x74   : > { %1126 = vrot.lane.b32.xlu2 %v2750_v61, %s2261_s7  ;;  %v2759_v15 = vpack.c.b16 %v1077_v9, %v1076_v23  ;;  %v1972_v48 = vrot.slane %v2512_v58, 9  ;;  %v806_v18 = vrot.slane %v2519_v22, 5  ;;  %v1075_v21 = vunpack.c.l.b16 %v782_v4 }
  0x75   : > { %1068 = vrot.lane.b32.xlu0 %v2752_v16, %s2260_s6  ;;  %v814_v37 = vsel %vm2679_vm5, %v1973_v25, %v813_v17  ;;  %v815_v45 = vrot.slane %v813_v17, 4  ;;  %v809_v29 = vrot.slane %v2527_v30, 5  ;;  %v1971_v22 = vrot.slane %v2408_v44, 9 }
  0x76   : > { %1124 = vrot.lane.b32.xlu1 %v2759_v15, %s2261_s7  ;;  %v1084_v0 = vunpack.c.l.b16 %v814_v37  ;;  %v807_v1 = vsel %vm2679_vm5, %v1972_v48, %v806_v18  ;;  %v808_v58 = vrot.slane %v806_v18, 4  ;;  %v2775_v57 = vpack.c.b16 %v1075_v21, %v1074_v6 }
  0x77   : > { %v817_v2 = vsel %vm2679_vm5, %v815_v45, %v816_v10  ;;  %v1082_v63 = vunpack.c.l.b16 %v807_v1  ;;  %v799_v14 = vrot.slane %v2416_v56, 5  ;;  %v802_v5 = vrot.slane %v2422_v62, 5 }
  0x78   : > { %v1085_v23 = vunpack.c.l.b16 %v817_v2  ;;  %v810_v30 = vsel %vm2679_vm5, %v808_v58, %v809_v29  ;;  %v1976_v19 = vrot.slane %v2554_v13, 9  ;;  %v834_v49 = vrot.slane %v2567_v41, 5 }
  0x79   : > { %v1083_v7 = vunpack.c.l.b16 %v810_v30  ;;  %v800_v44 = vsel %vm2679_vm5, %v1971_v22, %v799_v14  ;;  %v801_v42 = vrot.slane %v799_v14, 4  ;;  %v837_v35 = vrot.slane %v2571_v51, 5 }
  0x7a   : > { %v2787_v40 = vpack.c.b16 %v1085_v23, %v1084_v0  ;;  %v1975_v56 = vrot.slane %v2577_v3, 9  ;;  %v835_v13 = vsel %vm2679_vm5, %v1976_v19, %v834_v49  ;;  %v836_v47 = vrot.slane %v834_v49, 4 }
  0x7b   : > { %v2791_v36 = vpack.c.b16 %v1083_v7, %v1082_v63  ;;  %v803_v62 = vsel %vm2679_vm5, %v801_v42, %v802_v5  ;;  %v1080_v9 = vunpack.c.l.b16 %v800_v44  ;;  %v1090_v41 = vunpack.c.l.b16 %v835_v13  ;;  %v3559_v7 = vld [vmem:[#allocation12_spill] sm:$0xff] }
  0x7c   : > { %1132 = vrot.lane.b32.xlu2 %v2787_v40, %s2261_s7  ;;  %v827_v55 = vrot.slane %v2585_v38, 5  ;;  %v830_v51 = vrot.slane %v2593_v53, 5  ;;  %v1081_v3 = vunpack.c.l.b16 %v803_v62  ;;  %v838_v6 = vsel %vm2679_vm5, %v836_v47, %v837_v35 }
  0x7d   : > { %1122 = vrot.lane.b32.xlu0 %v2775_v57, %s2261_s7  ;;  %v1974_v25 = vrot.slane %v2467_v52, 9  ;;  %v820_v17 = vrot.slane %v2477_v8, 5  ;;  %v1091_v10 = vunpack.c.l.b16 %v838_v6  ;;  %v823_v53 = vrot.slane %v2483_v20, 5  ;;  %v3561_v6 = vld [vmem:[#allocation17_spill] sm:$0xff] }
  0x7e   : > { %1130 = vrot.lane.b32.xlu1 %v2791_v36, %s2261_s7  ;;  %v828_v38 = vsel %vm2679_vm5, %v1975_v56, %v827_v55  ;;  %v829_v4 = vrot.slane %v827_v55, 4  ;;  %v1979_v21 = vrot.slane %v2620_v12, 9  ;;  %v855_v45 = vrot.slane %v2631_v28, 5  ;;  %v3560_v55 = vld [vmem:[#allocation15_spill] sm:$0xff] }
  0x7f   : > { %v1088_v48 = vunpack.c.l.b16 %v828_v38  ;;  %v822_v18 = vrot.slane %v820_v17, 4  ;;  %v2813_v37 = vpack.c.b16 %v1091_v10, %v1090_v41  ;;  %v821_v8 = vsel %vm2679_vm5, %v1974_v25, %v820_v17  ;;  %v3562_v10 = vld [vmem:[#allocation18_spill] sm:$0xff] }
  0x80   : > { %v831_v52 = vsel %vm2679_vm5, %v829_v4, %v830_v51  ;;  %v2820_v29 = vpack.c.b16 %v1081_v3, %v1080_v9  ;;  %v858_v1 = vrot.slane %v2639_v39, 5  ;;  %v1978_v20 = vrot.slane %v2643_v33, 9 }
  0x81   : > { %v1089_v0 = vunpack.c.l.b16 %v831_v52  ;;  %v824_v12 = vsel %vm2679_vm5, %v822_v18, %v823_v53  ;;  %v856_v58 = vsel %vm2679_vm5, %v1979_v21, %v855_v45  ;;  %v857_v22 = vrot.slane %v855_v45, 4 }
  0x82   : > { %v848_v2 = vrot.slane %v2656_v59, 5  ;;  %v1086_v14 = vunpack.c.l.b16 %v821_v8  ;;  %v851_v28 = vrot.slane %v2659_v11, 5  ;;  %v1977_v23 = vrot.slane %v2531_v32, 9 }
  0x83   : > { %v2829_v63 = vpack.c.b16 %v1089_v0, %v1088_v48  ;;  %v859_v39 = vsel %vm2679_vm5, %v857_v22, %v858_v1  ;;  %v1096_v33 = vunpack.c.l.b16 %v856_v58  ;;  %v1087_v59 = vunpack.c.l.b16 %v824_v12  ;;  %v2086_v1 = vld [vmem:[%s2354_s5 + $0xc] sm:$0xff]  ;;  %v1047_v58 = vpop.permute.xlu2 %1046 }
  0x84   : > { %1138 = vrot.lane.b32.xlu2 %v2813_v37, %s2261_s7  ;;  %v849_v30 = vsel %vm2679_vm5, %v1978_v20, %v848_v2  ;;  %v850_v5 = vrot.slane %v848_v2, 4  ;;  %v1097_v19 = vunpack.c.l.b16 %v859_v39  ;;  %v841_v11 = vrot.slane %v2546_v60, 5  ;;  %v2890_v22 = vld [vmem:[%s2354_s5 + $0x30] sm:$0xff]  ;;  %v2893_v2 = vld [vmem:[%s2354_s5 + $0x24] sm:$0xff] }
  0x85   : > { %1128 = vrot.lane.b32.xlu0 %v2820_v29, %s2261_s7  ;;  %v844_v32 = vrot.slane %v3559_v7, 5  ;;  %v1094_v42 = vunpack.c.l.b16 %v849_v30  ;;  %v1981_v49 = vrot.slane %v2693_v34, 9  ;;  %v869_v35 = vrot.slane %v2700_v43, 5  ;;  %v2910_v39 = vld [vmem:[%s2354_s5 + $0x48] sm:$0xff]  ;;  %v2095_v30 = vld [vmem:[%s2354_s5 + $0x78] sm:$0xff] }
  0x86   : > { %1136 = vrot.lane.b32.xlu1 %v2829_v63, %s2261_s7  ;;  %v852_v44 = vsel %vm2679_vm5, %v850_v5, %v851_v28  ;;  %v842_v62 = vsel %vm2679_vm5, %v1977_v23, %v841_v11  ;;  %v843_v13 = vrot.slane %v841_v11, 4  ;;  %v872_v60 = vrot.slane %v2709_v31, 5  ;;  %v2904_v28 = vld [vmem:[%s2354_s5 + $0x54] sm:$0xff]  ;;  %v2922_v5 = vld [vmem:[%s2354_s5 + $0x3c] sm:$0xff] }
  0x87   : > { %v1095_v56 = vunpack.c.l.b16 %v852_v44  ;;  %v2852_v47 = vpack.c.b16 %v1097_v19, %v1096_v33  ;;  %v1092_v9 = vunpack.c.l.b16 %v842_v62  ;;  %v871_v41 = vrot.slane %v869_v35, 4  ;;  %v2907_v23 = vld [vmem:[%s2354_s5 + $0x18] sm:$0xff]  ;;  %v2927_v19 = vld [vmem:[%s2354_s5 + $0x6c] sm:$0xff]  ;;  %v2955_v62 = vld [vmem:[%s2354_s5 + $0xc0] sm:$0xff] }
  0x88   : > { %v1980_v51 = vrot.slane %v3560_v55, 9  ;;  %v2855_v3 = vpack.c.b16 %v1087_v59, %v1086_v14  ;;  %v845_v34 = vsel %vm2679_vm5, %v843_v13, %v844_v32  ;;  %v862_v43 = vrot.slane %v3561_v6, 5  ;;  %v2937_v7 = vld [vmem:[%s2354_s5 + $0x9c] sm:$0xff]  ;;  %v2958_v13 = vld [vmem:[%s2354_s5 + $0x84] sm:$0xff] }
  0x89   : > { %v2860_v25 = vpack.c.b16 %v1095_v56, %v1094_v42  ;;  %v1093_v17 = vunpack.c.l.b16 %v845_v34  ;;  %v865_v38 = vrot.slane %v3562_v10, 5  ;;  %v870_v31 = vsel %vm2679_vm5, %v1981_v49, %v869_v35  ;;  %v2940_v32 = vld [vmem:[%s2354_s5 + $0x60] sm:$0xff]  ;;  %v2945_v42 = vld [vmem:[%s2354_s5 + $0x90] sm:$0xff]  ;;  %v3563_v34 = vld [vmem:[#allocation9_spill] sm:$0xff] }
  0x8a   : > { %v873_v4 = vsel %vm2679_vm5, %v871_v41, %v872_v60  ;;  %v863_v53 = vsel %vm2679_vm5, %v1980_v51, %v862_v43  ;;  %v864_v48 = vrot.slane %v862_v43, 4  ;;  %v1100_v8 = vunpack.c.l.b16 %v870_v31  ;;  %v2961_v60 = vld [vmem:[%s2354_s5 + $0xb4] sm:$0xff]  ;;  %v3564_v43 = vld [vmem:[#allocation7_spill] sm:$0xff] }
  0x8b   : > { %v2871_v18 = vpack.c.b16 %v1093_v17, %v1092_v9  ;;  %v1098_v21 = vunpack.c.l.b16 %v863_v53  ;;  %v1101_v45 = vunpack.c.l.b16 %v873_v4  ;;  %v2099_v9 = vld [vmem:[%s2354_s5 + $0xa8] sm:$0xff]  ;;  %v3565_v4 = vld [vmem:[#allocation10_spill] sm:$0xff]  ;;  %v1375_v53 = vsel %vm1360_vm6, %v2890_v22, %v1047_v58 }
  0x8c   : > { %1144 = vrot.lane.b32.xlu2 %v2852_v47, %s2261_s7  ;;  %v866_v52 = vsel %vm2679_vm5, %v864_v48, %v865_v38 }
  0x8d   : > { %1134 = vrot.lane.b32.xlu0 %v2855_v3, %s2261_s7  ;;  %v1099_v0 = vunpack.c.l.b16 %v866_v52  ;;  %v2882_v12 = vpack.c.b16 %v1101_v45, %v1100_v8  ;;  %v3566_v8 = vld [vmem:[#allocation20_spill] sm:$0xff] }
  0x8e   : > { %1142 = vrot.lane.b32.xlu1 %v2860_v25, %s2261_s7 }
  0x8f   : > { %v2880_v20 = vpack.c.b16 %v1099_v0, %v1098_v21 }
  0x91   : > { %v2899_v14 = vpop.permute.xlu2 %1048 }
  0x94   : > { %1153 = vrot.lane.b32.xlu2 %v2086_v1, %s2262_s8 }
  0x95   : > { %1140 = vrot.lane.b32.xlu0 %v2871_v18, %s2261_s7 }
  0x96   : > { %1148 = vrot.lane.b32.xlu1 %v2882_v12, %s2261_s7 }
  0x9c   : > { %1159 = vrot.lane.b32.xlu2 %v2890_v22, %s2262_s8 }
  0x9d   : > { %1146 = vrot.lane.b32.xlu0 %v2880_v20, %s2261_s7 }
  0x9e   : > { %1157 = vrot.lane.b32.xlu1 %v2893_v2, %s2262_s8 }
  0x9f   : > { %v2918_v33 = vpop.permute.xlu2 %1054  ;;  %v2929_v11 = vpop.permute.xlu1 %1042 }
  0xa3   : > { %v2924_v59 = vpop.permute.xlu0 %1038 }
  0xa4   : > { %1165 = vrot.lane.b32.xlu2 %v2904_v28, %s2262_s8 }
  0xa5   : > { %1155 = vrot.lane.b32.xlu0 %v2907_v23, %s2262_s8 }
  0xa6   : > { %1163 = vrot.lane.b32.xlu1 %v2910_v39, %s2262_s8 }
  0xac   : > { %1171 = vrot.lane.b32.xlu2 %v2095_v30, %s2262_s8 }
  0xad   : > { %1161 = vrot.lane.b32.xlu0 %v2922_v5, %s2262_s8  ;;  %v2942_v44 = vpop.permute.xlu2 %1060  ;;  %v1045_v56 = vpop.permute.xlu1 %1044 }
  0xae   : > { %1169 = vrot.lane.b32.xlu1 %v2927_v19, %s2262_s8 }
  0xb3   : > { %v1041_v49 = vpop.permute.xlu0 %1040 }
  0xb4   : > { %1177 = vrot.lane.b32.xlu2 %v2937_v7, %s2262_s8  ;;  %v1366_v35 = vsel %vm1360_vm6, %v2086_v1, %v1041_v49  ;;  %v2085_v49 = vld [vmem:[%s2354_s5] sm:$0xff] }
  0xb5   : > { %1167 = vrot.lane.b32.xlu0 %v2940_v32, %s2262_s8 }
  0xb6   : > { %1175 = vrot.lane.b32.xlu1 %v2945_v42, %s2262_s8 }
  0xbb   : > { %v1067_v41 = vpop.permute.xlu2 %1066  ;;  %v1053_v51 = vpop.permute.xlu1 %1052 }
  0xbc   : > { %1183 = vrot.lane.b32.xlu2 %v2955_v62, %s2262_s8  ;;  %v2967_v55 = vsel %vm1360_vm6, %v2099_v9, %v1067_v41  ;;  %v1384_v45 = vsel %vm1360_vm6, %v2904_v28, %v1053_v51  ;;  %v1363_v41 = vsel %vm1360_vm6, %v2085_v49, %v2924_v59  ;;  %v1372_v59 = vsel %vm1360_vm6, %v2893_v2, %v1045_v56 }
  0xbd   : > { %1173 = vrot.lane.b32.xlu0 %v2958_v13, %s2262_s8  ;;  %v1369_v49 = vsel %vm1360_vm6, %v2907_v23, %v2929_v11 }
  0xbe   : > { %1181 = vrot.lane.b32.xlu1 %v2961_v60, %s2262_s8 }
  0xc1   : > { %v1051_v10 = vpop.permute.xlu0 %1050 }
  0xc4   : > { %1192 = vrot.lane.b32.xlu2 %v3563_v34, %s2263_s9 }
  0xc5   : > { %1179 = vrot.lane.b32.xlu0 %v2099_v9, %s2262_s8  ;;  %v1121_v6 = vpop.permute.xlu2 %1120 }
  0xc6   : > { %1190 = vrot.lane.b32.xlu1 %v3564_v43, %s2263_s9  ;;  %v2979_v17 = vsel %vm1409_vm7, %v1366_v35, %v1121_v6 }
  0xc9   : > { %v1059_v38 = vpop.permute.xlu1 %1058 }
  0xca   : > { %v1393_v31 = vsel %vm1360_vm6, %v2095_v30, %v1059_v38  ;;  %v3567_v38 = vld [vmem:[#allocation19_spill] sm:$0xff] }
  0xcc   : > { %1239 = vrot.lane.b32.xlu2 %v2829_v63, %s2264_s10 }
  0xcd   : > { %1188 = vrot.lane.b32.xlu0 %v3565_v4, %s2263_s9 }
  0xce   : > { %1212 = vrot.lane.b32.xlu1 %v2688_v27, %s2263_s9  ;;  %v1127_v48 = vpop.permute.xlu2 %1126 }
  0xcf   : > { %v2991_v21 = vsel %vm1409_vm7, %v1375_v53, %v1127_v48  ;;  %v1057_v52 = vpop.permute.xlu0 %1056  ;;  %v3568_v53 = vld [vmem:[#allocation8_spill] sm:$0xff] }
  0xd4   : > { %1282 = vrot.lane.b32.xlu2 %v2099_v9, %s2265_s11 }
  0xd5   : > { %1204 = vrot.lane.b32.xlu0 %v3566_v8, %s2263_s9 }
  0xd6   : > { %1274 = vrot.lane.b32.xlu1 %v2095_v30, %s2265_s11  ;;  %v1133_v0 = vpop.permute.xlu2 %1132 }
  0xd7   : > { %v3000_v1 = vsel %vm1409_vm7, %v1384_v45, %v1133_v0 }
  0xd8   : > { %v1065_v58 = vpop.permute.xlu1 %1064 }
  0xd9   : > { %v1402_v4 = vsel %vm1360_vm6, %v2937_v7, %v1065_v58 }
  0xdc   : > { %1344 = vrot.lane.b32.xlu2 %v2813_v37, %s2266_s12 }
  0xdd   : > { %1247 = vrot.lane.b32.xlu0 %v2852_v47, %s2264_s10  ;;  %v1063_v35 = vpop.permute.xlu0 %1062 }
  0xde   : > { %1317 = vrot.lane.b32.xlu1 %v2669_v46, %s2267_s13  ;;  %v1139_v9 = vpop.permute.xlu2 %1138 }
  0xdf   : > { %v3010_v30 = vsel %vm1409_vm7, %v1393_v31, %v1139_v9 }
  0xe0   : > { %v1119_v51 = vpop.permute.xlu1 %1118 }
  0xe1   : > { %v1411_v6 = vsel %vm1409_vm7, %v1363_v41, %v1119_v51  ;;  %v1381_v41 = vsel %vm1360_vm6, %v2910_v39, %v1051_v10 }
  0xe4   : > { %1223 = vrot.lane.b32.xlu2 %v2719_v24, %s2264_s10 }
  0xe5   : > { %1309 = vrot.lane.b32.xlu0 %v3567_v38, %s2267_s13 }
  0xe6   : > { %1196 = vrot.lane.b32.xlu1 %v3568_v53, %s2263_s9  ;;  %v1145_v31 = vpop.permute.xlu2 %1144 }
  0xe7   : > { %v1069_v48 = vpop.permute.xlu0 %1068  ;;  %v3024_v45 = vsel %vm1409_vm7, %v1402_v4, %v1145_v31 }
  0xe8   : > { %v1125_v0 = vpop.permute.xlu1 %1124 }
  0xe9   : > { %v1417_v24 = vsel %vm1409_vm7, %v1372_v59, %v1125_v0  ;;  %v1390_v59 = vsel %vm1360_vm6, %v2927_v19, %v1057_v52 }
  0xec   : > { %1266 = vrot.lane.b32.xlu2 %v2910_v39, %s2265_s11 }
  0xed   : > { %1352 = vrot.lane.b32.xlu0 %v2880_v20, %s2266_s12 }
  0xee   : > { %1258 = vrot.lane.b32.xlu1 %v2907_v23, %s2265_s11  ;;  %v1154_v58 = vpop.permute.xlu2 %1153  ;;  %v3569_v23 = vld [vmem:[#allocation14_spill] sm:$0xff] }
  0xef   : > { %v1123_v9 = vpop.permute.xlu0 %1122  ;;  %v3039_v56 = vsel %vm1442_vm8, %v1411_v6, %v1154_v58  ;;  %v1378_v6 = vsel %vm1360_vm6, %v2922_v5, %v2899_v14 }
  0xf0   : > { %v1415_v51 = vsel %vm1409_vm7, %v1369_v49, %v1123_v9  ;;  %v1131_v4 = vpop.permute.xlu1 %1130 }
  0xf1   : > { %v1423_v31 = vsel %vm1409_vm7, %v1381_v41, %v1131_v4  ;;  %v1399_v41 = vsel %vm1360_vm6, %v2945_v42, %v1063_v35  ;;  %v1396_v35 = vsel %vm1360_vm6, %v2958_v13, %v2942_v44 }
  0xf4   : > { %1328 = vrot.lane.b32.xlu2 %v2775_v57, %s2266_s12 }
  0xf5   : > { %1231 = vrot.lane.b32.xlu0 %v2820_v29, %s2264_s10 }
  0xf6   : > { %1301 = vrot.lane.b32.xlu1 %v3569_v23, %s2267_s13  ;;  %v1160_v11 = vpop.permute.xlu2 %1159 }
  0xf7   : > { %v1129_v39 = vpop.permute.xlu0 %1128  ;;  %v3055_v10 = vsel %vm1442_vm8, %v1417_v24, %v1160_v11  ;;  %v1387_v24 = vsel %vm1360_vm6, %v2940_v32, %v2918_v33  ;;  %v1408_v11 = vsel %vm1360_vm6, %v2961_v60, %v1069_v48 }
  0xf8   : > { %v1421_v0 = vsel %vm1409_vm7, %v1378_v6, %v1129_v39  ;;  %v1137_v58 = vpop.permute.xlu1 %1136 }
  0xf9   : > { %v1429_v49 = vsel %vm1409_vm7, %v1390_v59, %v1137_v58 }
  0xfc   : > { %1214 = vrot.lane.b32.xlu2 %v2669_v46, %s2263_s9 }
  0xfd   : > { %1293 = vrot.lane.b32.xlu0 %v3564_v43, %s2267_s13 }
  0xfe   : > { %1206 = vrot.lane.b32.xlu1 %v3567_v38, %s2263_s9  ;;  %v1166_v14 = vpop.permute.xlu2 %1165 }
  0xff   : > { %v1135_v52 = vpop.permute.xlu0 %1134  ;;  %v3071_v9 = vsel %vm1442_vm8, %v1423_v31, %v1166_v14 }
 0x100   : > { %v3076_v46 = vsel %vm1409_vm7, %v1387_v24, %v1135_v52  ;;  %v1143_v4 = vpop.permute.xlu1 %1142 }
 0x101   : > { %v3079_v43 = vsel %vm1409_vm7, %v1399_v41, %v1143_v4 }
 0x104   : > { %1276 = vrot.lane.b32.xlu2 %v2958_v13, %s2265_s11 }
 0x105   : > { %1336 = vrot.lane.b32.xlu0 %v2791_v36, %s2266_s12 }
 0x106   : > { %1249 = vrot.lane.b32.xlu1 %v2880_v20, %s2264_s10  ;;  %v1172_v33 = vpop.permute.xlu2 %1171  ;;  %v3570_v20 = vld [vmem:[#allocation16_spill] sm:$0xff] }
 0x107   : > { %v1141_v38 = vpop.permute.xlu0 %1140  ;;  %v3091_v31 = vsel %vm1442_vm8, %v1429_v49, %v1172_v33 }
 0x108   : > { %v1433_v6 = vsel %vm1409_vm7, %v1396_v35, %v1141_v38  ;;  %v1149_v39 = vpop.permute.xlu1 %1148 }
 0x109   : > { %v1441_v59 = vsel %vm1409_vm7, %v1408_v11, %v1149_v39  ;;  %v318_v39 = vld [vmem:[%s2354_s5 + $0xc0] sm:$0xf] }
 0x10c   : > { %1319 = vrot.lane.b32.xlu2 %v2752_v16, %s2267_s13 }
 0x10d   : > { %1241 = vrot.lane.b32.xlu0 %v2813_v37, %s2264_s10 }
 0x10e   : > { %1311 = vrot.lane.b32.xlu1 %v3570_v20, %s2267_s13  ;;  %v3103_v44 = vpop.permute.xlu2 %1177 }
 0x10f   : > { %v1147_v13 = vpop.permute.xlu0 %1146 }
 0x110   : > { %v1439_v48 = vsel %vm1409_vm7, %v2967_v55, %v1147_v13  ;;  %v1158_v58 = vpop.permute.xlu1 %1157 }
 0x111   : > { %v1448_v49 = vsel %vm1442_vm8, %v1415_v51, %v1158_v58 }
 0x114   : > { %1198 = vrot.lane.b32.xlu2 %v3569_v23, %s2263_s9 }
 0x115   : > { %1284 = vrot.lane.b32.xlu0 %v2961_v60, %s2265_s11 }
 0x116   : > { %1354 = vrot.lane.b32.xlu1 %v2882_v12, %s2266_s12  ;;  %v1184_v37 = vpop.permute.xlu2 %1183 }
 0x117   : > { %v1156_v14 = vpop.permute.xlu0 %1155  ;;  %v3115_v24 = vsel %vm1442_vm8, %v1441_v59, %v1184_v37  ;;  %v319_v59 = vld [vmem:[%s2354_s5 + $0xc4] sm:$0xf]  ;;  %v875_v37 = vshrl.u32 %v318_v39, 16 }
 0x118   : > { %v3119_v55 = vsel %vm1442_vm8, %v2979_v17, %v1156_v14  ;;  %v1164_v52 = vpop.permute.xlu1 %1163  ;;  %v878_v14 = vshll.u32 %v318_v39, 16 }
 0x119   : > { %v3122_v51 = vsel %vm1442_vm8, %v1421_v0, %v1164_v52  ;;  %v884_v52 = vshll.u32 %v319_v59, 16 }
 0x11c   : > { %1260 = vrot.lane.b32.xlu2 %v2893_v2, %s2265_s11  ;;  %v3571_v2 = vld [vmem:[#allocation13_spill] sm:$0xff] }
 0x11d   : > { %1346 = vrot.lane.b32.xlu0 %v2871_v18, %s2266_s12 }
 0x11e   : > { %1233 = vrot.lane.b32.xlu1 %v2791_v36, %s2264_s10  ;;  %v1193_v60 = vpop.permute.xlu2 %1192 }
 0x11f   : > { %v1162_v23 = vpop.permute.xlu0 %1161  ;;  %v3131_v41 = vsel %vm1475_vm9, %v1448_v49, %v1193_v60  ;;  %v903_v49 = vrot.slane %v319_v59, 5  ;;  %v888_v60 = vshrl.u32 %v319_v59, 16 }
 0x120   : > { %v3135_v17 = vsel %vm1442_vm8, %v2991_v21, %v1162_v23  ;;  %v3137_v0 = vpop.permute.xlu1 %1169  ;;  %v1982_v23 = vrot.slane %v318_v39, 9 }
 0x124   : > { %1303 = vrot.lane.b32.xlu2 %v3571_v2, %s2267_s13 }
 0x125   : > { %1225 = vrot.lane.b32.xlu0 %v2775_v57, %s2264_s10  ;;  %v1644_v57 = vld [vmem:[%s3508_s0 + $0x10] sm:$0x3] }
 0x126   : > { %1295 = vrot.lane.b32.xlu1 %v3563_v34, %s2267_s13  ;;  %v3145_v36 = vpop.permute.xlu2 %1239  ;;  %v1654_v38 = vunpack.c.l.b16 %v1644_v57 }
 0x127   : > { %v1168_v4 = vpop.permute.xlu0 %1167 }
 0x128   : > { %v3149_v21 = vsel %vm1442_vm8, %v3000_v1, %v1168_v4  ;;  %v1176_v33 = vpop.permute.xlu1 %1175  ;;  %v1657_v34 = vpack.c.b16 %v1654_v38, %v1654_v38  ;;  %v905_v4 = vrot.slane %v903_v49, 4  ;;  %v877_v38 = vrot.slane %v875_v37, 4 }
 0x129   : > { %v3152_v35 = vsel %vm1442_vm8, %v1433_v6, %v1176_v33 }
 0x12a   : > { %v1695_v11 = vsel %vm1693_vm10, %v1657_v34, 0  ;;  %v886_v34 = vrot.slane %v884_v52, 5 }
 0x12b   : > { %2107 = vmatpush.bf16.msra.mxu2 %v1695_v11  ;;  %2108 = vmatpush.bf16.msra.mxu3 %v1695_v11 }
 0x12c   : > { %1208 = vrot.lane.b32.xlu2 %v3570_v20, %s2263_s9  ;;  %1702 = vmatpush.bf16.msra.mxu0 %v1695_v11 }
 0x12d   : > { %1268 = vrot.lane.b32.xlu0 %v2904_v28, %s2265_s11  ;;  %v2104_v28 = vld [vmem:[%s3508_s0 + $0x8] sm:$0xff]  ;;  %2106 = vmatpush.bf16.msra.mxu1 %v1695_v11  ;;  %v890_v11 = vrot.slane %v888_v60, 4 }
 0x12e   : > { %1338 = vrot.lane.b32.xlu1 %v2787_v40, %s2266_s12  ;;  %v3163_v1 = vpop.permute.xlu2 %1282 }
 0x12f   : > { %v1174_v6 = vpop.permute.xlu0 %1173  ;;  %2110 = vmatpush.bf16.msra.mxu2 %v2104_v28  ;;  %2111 = vmatpush.bf16.msra.mxu3 %v2104_v28 }
 0x130   : > { %v3169_v20 = vsel %vm1442_vm8, %v3010_v30, %v1174_v6  ;;  %v1182_v13 = vpop.permute.xlu1 %1181  ;;  %v320_v30 = vld [vmem:[%s2354_s5 + $0xc8] sm:$0x1]  ;;  %1703 = vmatpush.bf16.msra.mxu0 %v2104_v28 }
 0x131   : > { %v3175_v58 = vsel %vm1442_vm8, %v1439_v48, %v1182_v13  ;;  %v906_v33 = vrot.slane %v320_v30, 5  ;;  %v2103_v48 = vld [vmem:[%s3508_s0] sm:$0xff]  ;;  %2109 = vmatpush.bf16.msra.mxu1 %v2104_v28  ;;  %v894_v52 = vshll.u32 %v320_v30, 16 }
 0x133   : > { %2113 = vmatpush.bf16.msra.mxu2 %v2103_v48  ;;  %2114 = vmatpush.bf16.msra.mxu3 %v2103_v48  ;;  %v907_v28 = vsel %vm2679_vm5, %v905_v4, %v906_v33  ;;  %v896_v4 = vrot.slane %v894_v52, 5 }
 0x134   : > { %1251 = vrot.lane.b32.xlu2 %v2882_v12, %s2264_s10  ;;  %v880_v12 = vrot.slane %v878_v14, 5  ;;  %1704 = vmatpush.bf16.msra.mxu0 %v2103_v48  ;;  %v891_v14 = vor.u32 %v890_v11, %v886_v34  ;;  %v1221_v60 = vunpack.c.l.b16 %v907_v28 }
 0x135   : > { %1330 = vrot.lane.b32.xlu0 %v2759_v15, %s2266_s12  ;;  %2112 = vmatpush.bf16.msra.mxu1 %v2103_v48 }
 0x136   : > { %1243 = vrot.lane.b32.xlu1 %v2871_v18, %s2264_s10  ;;  %v3187_v57 = vpop.permute.xlu2 %1344  ;;  %v904_v18 = vsel %vm2679_vm5, %v1982_v23, %v903_v49  ;;  %v881_v37 = vor.u32 %v880_v12, %v877_v38  ;;  %v892_v23 = vrot.slane %v891_v14, 4 }
 0x137   : > { %v1180_v6 = vpop.permute.xlu0 %1179 }
 0x138   : > { %v3191_v39 = vsel %vm1442_vm8, %v3024_v45, %v1180_v6  ;;  %v1191_v59 = vpop.permute.xlu1 %1190  ;;  %v1220_v45 = vunpack.c.l.b16 %v904_v18  ;;  %v882_v49 = vrot.slane %v881_v37, 4  ;;  %v897_v12 = vsel %vm2392_vm2, %v892_v23, %v896_v4 }
 0x139   : > { %v3195_v13 = vsel %vm1475_vm9, %v3119_v55, %v1191_v59  ;;  %v1460_v37 = vsel %vm1442_vm8, %v3076_v46, %v3137_v0 }
 0x13a   : > { %v3211_v30 = vpack.c.b16 %v1221_v60, %v1220_v45  ;;  %v887_v38 = vsel %vm2392_vm2, %v882_v49, %v886_v34  ;;  %v1468_v45 = vsel %vm1442_vm8, %v3079_v43, %v3103_v44  ;;  %v3252_v49 = vld [vmem:[%s2354_s5 + $0xcc] sm:$0xf] }
 0x13b   : > { %v912_v43 = vshll.u32 %v3252_v49, 16 }
 0x13c   : > { %1313 = vrot.lane.b32.xlu2 %v2717_v54, %s2267_s13 }
 0x13d   : > { %1216 = vrot.lane.b32.xlu0 %v2752_v16, %s2263_s9  ;;  %v1185_v16 = vunpack.c.l.b16 %v887_v38  ;;  %v909_v38 = vshrl.u32 %v3252_v49, 16 }
 0x13e   : > { %1286 = vrot.lane.b32.xlu1 %v2955_v62, %s2265_s11  ;;  %v3207_v55 = vpop.permute.xlu2 %1223  ;;  %v1186_v62 = vunpack.c.l.b16 %v897_v12 }
 0x13f   : > { %v3209_v33 = vpop.permute.xlu0 %1188 }
 0x140   : > { %v1213_v48 = vpop.permute.xlu1 %1212  ;;  %v1187_v18 = vpack.c.b16 %v1186_v62, %v1185_v16 }
 0x141   : > { %v1501_v23 = vsel %vm1475_vm9, %v1468_v45, %v1213_v48 }
 0x144   : > { %1356 = vrot.lane.b32.xlu2 %v3211_v30, %s2266_s12 }
 0x145   : > { %1278 = vrot.lane.b32.xlu0 %v2945_v42, %s2265_s11 }
 0x146   : > { %1348 = vrot.lane.b32.xlu1 %v2860_v25, %s2266_s12  ;;  %v3223_v11 = vpop.permute.xlu2 %1266 }
 0x147   : > { %v1205_v6 = vpop.permute.xlu0 %1204 }
 0x148   : > { %v1275_v59 = vpop.permute.xlu1 %1274  ;;  %v1493_v14 = vsel %vm1475_vm9, %v1460_v37, %v1205_v6  ;;  %v911_v6 = vrot.slane %v909_v38, 4 }
 0x14c   : > { %1235 = vrot.lane.b32.xlu2 %v2787_v40, %s2264_s10  ;;  %v3572_v40 = vld [vmem:[#allocation6_spill] sm:$0xff] }
 0x14d   : > { %1321 = vrot.lane.b32.xlu0 %v1187_v18, %s2267_s13 }
 0x14e   : > { %1227 = vrot.lane.b32.xlu1 %v2759_v15, %s2264_s10  ;;  %v3230_v34 = vpop.permute.xlu2 %1328  ;;  %v1526_v15 = vsel %vm1508_vm11, %v1493_v14, %v3145_v36  ;;  %v3255_v36 = vld [vmem:[%s2354_s5 + $0xd0] sm:$0xf] }
 0x14f   : > { %v1248_v42 = vpop.permute.xlu0 %1247  ;;  %v1559_v0 = vsel %vm1541_vm12, %v1526_v15, %v1275_v59  ;;  %v918_v44 = vshll.u32 %v3255_v36, 16  ;;  %v922_v12 = vshrl.u32 %v3255_v36, 16  ;;  %v914_v59 = vrot.slane %v912_v43, 5  ;;  %v2102_v43 = vld [vmem:[%s2354_s5 + $0xcc] sm:$0xff] }
 0x150   : > { %v1318_v28 = vpop.permute.xlu1 %1317  ;;  %v1534_v4 = vsel %vm1508_vm11, %v1501_v23, %v1248_v42 }
 0x151   : > { %v1567_v48 = vsel %vm1541_vm12, %v1534_v4, %v3163_v1  ;;  %v920_v42 = vrot.slane %v918_v44, 5  ;;  %v924_v37 = vrot.slane %v922_v12, 4  ;;  %v323_v1 = vld [vmem:[%s2354_s5 + $0xd4] sm:$0x1]  ;;  %s2105_s5 = sshll.u32 %s2250_s18, 8 }
 0x154   : > { %1297 = vrot.lane.b32.xlu2 %v3572_v40, %s2267_s13 }
 0x155   : > { %1200 = vrot.lane.b32.xlu0 %v3571_v2, %s2263_s9 }
 0x156   : > { %1270 = vrot.lane.b32.xlu1 %v2940_v32, %s2265_s11  ;;  %v3244_v46 = vpop.permute.xlu2 %1214 }
 0x157   : > { %v1310_v52 = vpop.permute.xlu0 %1309  ;;  %v1503_v50 = vsel %vm1475_vm9, %v3191_v39, %v3244_v46 }
 0x158   : > { %v1592_v2 = vsel %vm1574_vm13, %v1559_v0, %v1310_v52  ;;  %v1197_v60 = vpop.permute.xlu1 %1196  ;;  %v925_v0 = vor.u32 %v924_v37, %v920_v42  ;;  %v3573_v52 = vld [vmem:[#allocation11_spill] sm:$0xff]  ;;  %v940_v37 = vrot.slane %v323_v1, 5 }
 0x159   : > { %v1625_v32 = vsel %vm1607_vm14, %v1592_v2, %v3187_v57  ;;  %v1600_v57 = vsel %vm1574_vm13, %v1567_v48, %v1318_v28  ;;  %v928_v28 = vshll.u32 %v323_v1, 16 }
 0x15a   : > { %2072 = vmatmul.msk.bf16.vlgmr.msra.gmra.mxu2 %vm1660_vm15, %v1625_v32  ;;  %v926_v23 = vrot.slane %v925_v0, 4 }
 0x15b   : > { %v930_v32 = vrot.slane %v928_v28, 5 }
 0x15c   : > { %1340 = vrot.lane.b32.xlu2 %v2855_v3, %s2266_s12 }
 0x15d   : > { %1262 = vrot.lane.b32.xlu0 %v2890_v22, %s2265_s11  ;;  %v915_v22 = vor.u32 %v914_v59, %v911_v6  ;;  %v931_v12 = vsel %vm2392_vm2, %v926_v23, %v930_v32 }
 0x15e   : > { %1332 = vrot.lane.b32.xlu1 %v2750_v61, %s2266_s12  ;;  %v3275_v16 = vpop.permute.xlu2 %1276 }
 0x15f   : > { %v1353_v62 = vpop.permute.xlu0 %1352  ;;  %v916_v2 = vrot.slane %v915_v22, 4 }
 0x160   : > { %v1633_v14 = vsel %vm1607_vm14, %v1600_v57, %v1353_v62  ;;  %v1259_v15 = vpop.permute.xlu1 %1258  ;;  %v1291_v57 = vunpack.c.l.b16 %v931_v12 }
 0x161   : > { %2076 = vmatmul.msk.bf16.vlgmr.msra.gmra.mxu3 %vm1660_vm15, %v1633_v14  ;;  %v921_v44 = vsel %vm2392_vm2, %v916_v2, %v920_v42 }
 0x162   : > { %v1290_v48 = vunpack.c.l.b16 %v921_v44 }
 0x164   : > { %1245 = vrot.lane.b32.xlu2 %v2860_v25, %s2264_s10  ;;  %v1477_v25 = vsel %vm1475_vm9, %v3039_v56, %v3209_v33  ;;  %v1292_v33 = vpack.c.b16 %v1291_v57, %v1290_v48 }
 0x165   : > { %1305 = vrot.lane.b32.xlu0 %v3573_v52, %s2267_s13 }
 0x166   : > { %1218 = vrot.lane.b32.xlu1 %v1187_v18, %s2263_s9  ;;  %v1320_v4 = vpop.permute.xlu2 %1319  ;;  %v1510_v18 = vsel %vm1508_vm11, %v1477_v25, %v3207_v55 }
 0x167   : > { %v1232_v45 = vpop.permute.xlu0 %1231  ;;  %v1543_v26 = vsel %vm1541_vm12, %v1510_v18, %v1259_v15 }
 0x168   : > { %v1302_v38 = vpop.permute.xlu1 %1301 }
 0x16c   : > { %1288 = vrot.lane.b32.xlu2 %v2102_v43, %s2265_s11 }
 0x16d   : > { %1210 = vrot.lane.b32.xlu0 %v2717_v54, %s2263_s9  ;;  %v1485_v54 = vsel %vm1475_vm9, %v3135_v17, %v1197_v60  ;;  %v1983_v17 = vrot.slane %v3252_v49, 9 }
 0x16e   : > { %1280 = vrot.lane.b32.xlu1 %v2937_v7, %s2265_s11  ;;  %v1199_v55 = vpop.permute.xlu2 %1198  ;;  %v937_v7 = vrot.slane %v3255_v36, 5  ;;  %v1518_v42 = vsel %vm1508_vm11, %v1485_v54, %v1232_v45 }
 0x16f   : > { %v1294_v62 = vpop.permute.xlu0 %1293 }
 0x170   : > { %v1576_v6 = vsel %vm1574_vm13, %v1543_v26, %v1294_v62  ;;  %v1207_v59 = vpop.permute.xlu1 %1206  ;;  %v939_v60 = vrot.slane %v937_v7, 4 }
 0x171   : > { %v1609_v56 = vsel %vm1607_vm14, %v1576_v6, %v3230_v34  ;;  %v1551_v34 = vsel %vm1541_vm12, %v1518_v42, %v3223_v11 }
 0x172   : > { %2064 = vmatmul.msk.bf16.vlgmr.msra.gmra.mxu0 %vm1660_vm15, %v1609_v56  ;;  %v1584_v14 = vsel %vm1574_vm13, %v1551_v34, %v1302_v38 }
 0x174   : > { %1350 = vrot.lane.b32.xlu2 %v2852_v47, %s2266_s12  ;;  %v938_v47 = vsel %vm2679_vm5, %v1983_v17, %v937_v7 }
 0x175   : > { %1253 = vrot.lane.b32.xlu0 %v3211_v30, %s2264_s10  ;;  %v941_v30 = vsel %vm2679_vm5, %v939_v60, %v940_v37  ;;  %v1325_v49 = vunpack.c.l.b16 %v938_v47 }
 0x176   : > { %1323 = vrot.lane.b32.xlu1 %v1292_v33, %s2267_s13  ;;  %v1261_v11 = vpop.permute.xlu2 %1260  ;;  %v1326_v1 = vunpack.c.l.b16 %v941_v30 }
 0x177   : > { %v1337_v36 = vpop.permute.xlu0 %1336 }
 0x178   : > { %v1617_v15 = vsel %vm1607_vm14, %v1584_v14, %v1337_v36  ;;  %v1250_v22 = vpop.permute.xlu1 %1249  ;;  %v1327_v45 = vpack.c.b16 %v1326_v1, %v1325_v49 }
 0x179   : > { %2068 = vmatmul.msk.bf16.vlgmr.msra.gmra.mxu1 %vm1660_vm15, %v1617_v15 }
 0x17c   : > { %1202 = vrot.lane.b32.xlu2 %v3573_v52, %s2263_s9 }
 0x17d   : > { %1315 = vrot.lane.b32.xlu0 %v2688_v27, %s2267_s13  ;;  %v1536_v27 = vsel %vm1508_vm11, %v1503_v50, %v1250_v22 }
 0x17e   : > { %1194 = vrot.lane.b32.xlu1 %v3572_v40, %s2263_s9  ;;  %v1304_v52 = vpop.permute.xlu2 %1303  ;;  %s1834_s9 = scalar_lea.hbm %s3512_s4, %s2105_s5 }
 0x17f   : > { %v1242_v0 = vpop.permute.xlu0 %1241 }
 0x180   : > { %v1312_v28 = vpop.permute.xlu1 %1311 }
 0x184   : > { %1264 = vrot.lane.b32.xlu2 %v2922_v5, %s2265_s11  ;;  %v1495_v5 = vsel %vm1475_vm9, %v3091_v31, %v1207_v59 }
 0x185   : > { %1358 = vrot.lane.b32.xlu0 %v1327_v45, %s2266_s12  ;;  %v1528_v43 = vsel %vm1508_vm11, %v1495_v5, %v1242_v0 }
 0x186   : > { %1237 = vrot.lane.b32.xlu1 %v2855_v3, %s2264_s10  ;;  %v1561_v3 = vsel %vm1541_vm12, %v1528_v43, %v3275_v16  ;;  %v1209_v46 = vpop.permute.xlu2 %1208 }
 0x187   : > { %v1285_v2 = vpop.permute.xlu0 %1284  ;;  %v1594_v31 = vsel %vm1574_vm13, %v1561_v3, %v1312_v28  ;;  %v1497_v33 = vsel %vm1475_vm9, %v3169_v20, %v1209_v46 }
 0x188   : > { %v1569_v40 = vsel %vm1541_vm12, %v1536_v27, %v1285_v2  ;;  %v1355_v23 = vpop.permute.xlu1 %1354 }
 0x189   : > { %v1602_v32 = vsel %vm1574_vm13, %v1569_v40, %v1320_v4 }
 0x18a   : > { %v1635_v38 = vsel %vm1607_vm14, %v1602_v32, %v1355_v23 }
 0x18b   : > { %2077 = vmatmul.msk.bf16.gmra.mxu3 %vm1660_vm15, %v1635_v38 }
 0x18c   : > { %1307 = vrot.lane.b32.xlu2 %v3566_v8, %s2267_s13 }
 0x18d   : > { %1229 = vrot.lane.b32.xlu0 %v2750_v61, %s2264_s10  ;;  %s1835_s10 = sshll.u32 %s3406_s30, 4  ;;  %s1836_s10 = int_to_ptr.vmem [resolvable:$true] %s1835_s10 }
 0x18e   : > { %1299 = vrot.lane.b32.xlu1 %v3568_v53, %s2267_s13  ;;  %v1252_v16 = vpop.permute.xlu2 %1251  ;;  %v1487_v53 = vsel %vm1475_vm9, %v3122_v51, %v1199_v55 }
 0x18f   : > { %v1347_v39 = vpop.permute.xlu0 %1346 }
 0x190   : > { %v1627_v4 = vsel %vm1607_vm14, %v1594_v31, %v1347_v39  ;;  %v1234_v44 = vpop.permute.xlu1 %1233 }
 0x191   : > { %2073 = vmatmul.msk.bf16.gmra.mxu2 %vm1660_vm15, %v1627_v4  ;;  %v1520_v12 = vsel %vm1508_vm11, %v1487_v53, %v1234_v44 }
 0x195   : > { %1272 = vrot.lane.b32.xlu0 %v2927_v19, %s2265_s11  ;;  %s1837_s11 = sshll.u32 %s1834_s9, 4  ;;  %s1838_s11 = int_to_ptr.hbm [resolvable:$true] %s1837_s11 }
 0x196   : > { %1342 = vrot.lane.b32.xlu1 %v2829_v63, %s2266_s12  ;;  %v1314_v26 = vpop.permute.xlu2 %1313  ;;  %s2194_s13 = sshra.s32 %s1838_s11, 4  ;;  %s2195_s13 = int_to_ptr.hbm [resolvable:$true] %s2194_s13 }
 0x197   : > { %v1226_v61 = vpop.permute.xlu0 %1225  ;;  %s2196_s18 = scalar_lea.hbm %s2195_s13, 256  ;;  %p2201_p1 = scmp.lt.s32.totalorder %s2195_s13, %s3512_s4 }
 0x198   : > { %v1296_v8 = vpop.permute.xlu1 %1295  ;;  %v1512_v63 = vsel %vm1508_vm11, %v3195_v13, %v1226_v61  ;;  %p2197_p12 = scmp.ne.s32.totalorder %s2195_s13, %s2196_s18  ;;  %p2202_p2 = scmp.lt.s32.totalorder %s2200_s20, %s2196_s18 }
 0x19a   : > { %p2198_p13 = pnand %p2197_p12, %p2334_p4  ;;  %p2203_p3 = por %p2202_p2, %p2201_p1 }
 0x19c   : > { %p2199_p0 = pneg %p2198_p13 }
 0x19d   : > { %1334 = vrot.lane.b32.xlu0 %v2820_v29, %s2266_s12  ;;  %v1545_v29 = vsel %vm1541_vm12, %v1512_v63, %v1261_v11  ;;  %s1819_s12 = scalar_lea.sflag [#allocation4], %s246_s28 }
 0x19e   : > { %v1578_v51 = vsel %vm1574_vm13, %v1545_v29, %v1296_v8  ;;  %v1357_v56 = vpop.permute.xlu2 %1356  ;;  %p2204_p5 = pnand %p2203_p3, %p2199_p0 }
 0x19f   : > { %v1269_v25 = vpop.permute.xlu0 %1268 }
 0x1a0   : > { %v1553_v18 = vsel %vm1541_vm12, %v1520_v12, %v1269_v25  ;;  %v1339_v48 = vpop.permute.xlu1 %1338 }
 0x1a1   : > { %v1586_v19 = vsel %vm1574_vm13, %v1553_v18, %v1304_v52 }
 0x1a2   : > { %v1619_v57 = vsel %vm1607_vm14, %v1586_v19, %v1339_v48 }
 0x1a3   : > { %2069 = vmatmul.msk.bf16.gmra.mxu1 %vm1660_vm15, %v1619_v57 }
 0x1a6   : > { %v1236_v42 = vpop.permute.xlu2 %1235 }
 0x1a7   : > { %v1331_v62 = vpop.permute.xlu0 %1330 }
 0x1a8   : > { %v1611_v6 = vsel %vm1607_vm14, %v1578_v51, %v1331_v62  ;;  %v1244_v59 = vpop.permute.xlu1 %1243 }
 0x1a9   : > { %2065 = vmatmul.msk.bf16.gmra.mxu0 %vm1660_vm15, %v1611_v6  ;;  %v1530_v13 = vsel %vm1508_vm11, %v1497_v33, %v1244_v59 }
 0x1ae   : > { %v1298_v11 = vpop.permute.xlu2 %1297 }
 0x1af   : > { %v1217_v54 = vpop.permute.xlu0 %1216 }
 0x1b0   : > { %v1287_v55 = vpop.permute.xlu1 %1286  ;;  %v1505_v14 = vsel %vm1475_vm9, %v3175_v58, %v1217_v54 }
 0x1b1   : > { %v1538_v36 = vsel %vm1508_vm11, %v1505_v14, %v1252_v16 }
 0x1b2   : > { %v1571_v20 = vsel %vm1541_vm12, %v1538_v36, %v1287_v55 }
 0x1b6   : > { %v1341_v58 = vpop.permute.xlu2 %1340 }
 0x1b7   : > { %v1279_v7 = vpop.permute.xlu0 %1278 }
 0x1b8   : > { %v1563_v34 = vsel %vm1541_vm12, %v1530_v13, %v1279_v7  ;;  %v1349_v17 = vpop.permute.xlu1 %1348 }
 0x1b9   : > { %v1596_v60 = vsel %vm1574_vm13, %v1563_v34, %v1314_v26 }
 0x1ba   : > { %v1629_v37 = vsel %vm1607_vm14, %v1596_v60, %v1349_v17 }
 0x1bb   : > { %2074 = vmatmul.msk.bf16.gmra.mxu2 %vm1660_vm15, %v1629_v37 }
 0x1be   : > { %v1246_v40 = vpop.permute.xlu2 %1245 }
 0x1bf   : > { %v1322_v15 = vpop.permute.xlu0 %1321 }
 0x1c0   : > { %v1604_v22 = vsel %vm1574_vm13, %v1571_v20, %v1322_v15  ;;  %v1228_v47 = vpop.permute.xlu1 %1227 }
 0x1c1   : > { %v1637_v30 = vsel %vm1607_vm14, %v1604_v22, %v1357_v56  ;;  %v1514_v0 = vsel %vm1508_vm11, %v3131_v41, %v1228_v47 }
 0x1c2   : > { %2078 = vmatmul.msk.bf16.gmra.mxu3 %vm1660_vm15, %v1637_v30 }
 0x1c6   : > { %v1289_v31 = vpop.permute.xlu2 %1288 }
 0x1c7   : > { %v1201_v49 = vpop.permute.xlu0 %1200 }
 0x1c8   : > { %v1271_v1 = vpop.permute.xlu1 %1270  ;;  %v1489_v2 = vsel %vm1475_vm9, %v3071_v9, %v1201_v49 }
 0x1c9   : > { %v1522_v23 = vsel %vm1508_vm11, %v1489_v2, %v1236_v42 }
 0x1ca   : > { %v1555_v32 = vsel %vm1541_vm12, %v1522_v23, %v1271_v1 }
 0x1ce   : > { %v1351_v8 = vpop.permute.xlu2 %1350 }
 0x1cf   : > { %v1263_v28 = vpop.permute.xlu0 %1262 }
 0x1d0   : > { %v1547_v45 = vsel %vm1541_vm12, %v1514_v0, %v1263_v28  ;;  %v1333_v50 = vpop.permute.xlu1 %1332 }
 0x1d1   : > { %v1580_v52 = vsel %vm1574_vm13, %v1547_v45, %v1298_v11 }
 0x1d2   : > { %v1613_v27 = vsel %vm1607_vm14, %v1580_v52, %v1333_v50 }
 0x1d3   : > { %2066 = vmatmul.msk.bf16.gmra.mxu0 %vm1660_vm15, %v1613_v27 }
 0x1d6   : > { %v1203_v29 = vpop.permute.xlu2 %1202 }
 0x1d7   : > { %v1306_v41 = vpop.permute.xlu0 %1305  ;;  %v1491_v42 = vsel %vm1475_vm9, %v3149_v21, %v1203_v29 }
 0x1d8   : > { %v1588_v5 = vsel %vm1574_vm13, %v1555_v32, %v1306_v41  ;;  %v1219_v38 = vpop.permute.xlu1 %1218 }
 0x1d9   : > { %v1621_v43 = vsel %vm1607_vm14, %v1588_v5, %v1341_v58  ;;  %v1507_v26 = vsel %vm1475_vm9, %v3115_v24, %v1219_v38 }
 0x1da   : > { %2070 = vmatmul.msk.bf16.gmra.mxu1 %vm1660_vm15, %v1621_v43 }
 0x1dd   : > { %v1746_v3 = vpop.f32.mrf.mxu2 }
 0x1de   : > { %1802 = vst [vmem:[%s3406_s30 + $0x80] sm:$0xff] %v1746_v3  ;;  %v1265_v24 = vpop.permute.xlu2 %1264 }
 0x1df   : > { %v1211_v9 = vpop.permute.xlu0 %1210 }
 0x1e0   : > { %v1281_v39 = vpop.permute.xlu1 %1280  ;;  %v1499_v16 = vsel %vm1475_vm9, %v3152_v35, %v1211_v9 }
 0x1e1   : > { %v1532_v12 = vsel %vm1508_vm11, %v1499_v16, %v1246_v40 }
 0x1e2   : > { %v1565_v25 = vsel %vm1541_vm12, %v1532_v12, %v1281_v39 }
 0x1e4   : > { %v1766_v46 = vpop.f32.mrf.mxu3 }
 0x1e5   : > { %1810 = vst [vmem:[%s3406_s30 + $0xc0] sm:$0xff] %v1766_v46  ;;  %v1748_v4 = vpop.f32.mrf.mxu2 }
 0x1e6   : > { %1803 = vst [vmem:[%s3406_s30 + $0x88] sm:$0xff] %v1748_v4  ;;  %v1308_v34 = vpop.permute.xlu2 %1307 }
 0x1e7   : > { %v1254_v44 = vpop.permute.xlu0 %1253 }
 0x1e8   : > { %v1324_v61 = vpop.permute.xlu1 %1323  ;;  %v1540_v35 = vsel %vm1508_vm11, %v1507_v26, %v1254_v44 }
 0x1e9   : > { %v1573_v51 = vsel %vm1541_vm12, %v1540_v35, %v1289_v31 }
 0x1ea   : > { %v1606_v6 = vsel %vm1574_vm13, %v1573_v51, %v1324_v61 }
 0x1ec   : > { %v1768_v53 = vpop.f32.mrf.mxu3 }
 0x1ed   : > { %1811 = vst [vmem:[%s3406_s30 + $0xc8] sm:$0xff] %v1768_v53 }
 0x1ef   : > { %v1706_v18 = vpop.f32.mrf.mxu0  ;;  %v1316_v48 = vpop.permute.xlu0 %1315 }
 0x1f0   : > { %1786 = vst [vmem:[%s3406_s30] sm:$0xff] %v1706_v18  ;;  %v1598_v19 = vsel %vm1574_vm13, %v1565_v25, %v1316_v48  ;;  %v1195_v57 = vpop.permute.xlu1 %1194 }
 0x1f1   : > { %v1631_v63 = vsel %vm1607_vm14, %v1598_v19, %v1351_v8  ;;  %v1483_v20 = vsel %vm1475_vm9, %v3055_v10, %v1195_v57 }
 0x1f2   : > { %2075 = vmatmul.msk.bf16.gmra.mxu2 %vm1660_vm15, %v1631_v63 }
 0x1f6   : > { %v1726_v62 = vpop.f32.mrf.mxu1 }
 0x1f7   : > { %1794 = vst [vmem:[%s3406_s30 + $0x40] sm:$0xff] %v1726_v62  ;;  %v1708_v59 = vpop.f32.mrf.mxu0  ;;  %v1359_v56 = vpop.permute.xlu0 %1358 }
 0x1f8   : > { %1787 = vst [vmem:[%s3406_s30 + $0x8] sm:$0xff] %v1708_v59  ;;  %v1639_v54 = vsel %vm1607_vm14, %v1606_v6, %v1359_v56  ;;  %v1238_v55 = vpop.permute.xlu1 %1237 }
 0x1f9   : > { %2079 = vmatmul.msk.bf16.gmra.mxu3 %vm1660_vm15, %v1639_v54  ;;  %v1524_v17 = vsel %vm1508_vm11, %v1491_v42, %v1238_v55 }
 0x1fe   : > { %v1728_v33 = vpop.f32.mrf.mxu1 }
 0x1ff   : > { %1795 = vst [vmem:[%s3406_s30 + $0x48] sm:$0xff] %v1728_v33  ;;  %v1230_v13 = vpop.permute.xlu0 %1229 }
 0x200   : > { %v1300_v7 = vpop.permute.xlu1 %1299  ;;  %v1516_v22 = vsel %vm1508_vm11, %v1483_v20, %v1230_v13 }
 0x201   : > { %v1549_v21 = vsel %vm1541_vm12, %v1516_v22, %v1265_v24 }
 0x202   : > { %v1582_v30 = vsel %vm1574_vm13, %v1549_v21, %v1300_v7 }
 0x207   : > { %v1273_v60 = vpop.permute.xlu0 %1272 }
 0x208   : > { %v1557_v37 = vsel %vm1541_vm12, %v1524_v17, %v1273_v60  ;;  %v1343_v14 = vpop.permute.xlu1 %1342 }
 0x209   : > { %v1590_v36 = vsel %vm1574_vm13, %v1557_v37, %v1308_v34 }
 0x20a   : > { %v1623_v15 = vsel %vm1607_vm14, %v1590_v36, %v1343_v14 }
 0x20b   : > { %2071 = vmatmul.msk.bf16.gmra.mxu1 %vm1660_vm15, %v1623_v15 }
 0x20e   : > { %v1771_v47 = vpop.f32.mrf.mxu3 }
 0x20f   : > { %v1335_v11 = vpop.permute.xlu0 %1334  ;;  %1812 = vst [vmem:[%s3406_s30 + $0xd0] sm:$0xff] %v1771_v47 }
 0x210   : > { %v1615_v10 = vsel %vm1607_vm14, %v1582_v30, %v1335_v11 }
 0x211   : > { %2067 = vmatmul.msk.bf16.gmra.mxu0 %vm1660_vm15, %v1615_v10 }
 0x214   : > { %v1751_v49 = vpop.f32.mrf.mxu2 }
 0x215   : > { %1804 = vst [vmem:[%s3406_s30 + $0x90] sm:$0xff] %v1751_v49 }
 0x216   : > { %v1773_v1 = vpop.f32.mrf.mxu3 }
 0x217   : > { %1813 = vst [vmem:[%s3406_s30 + $0xd8] sm:$0xff] %v1773_v1 }
 0x21c   : > { %v1753_v58 = vpop.f32.mrf.mxu2 }
 0x21d   : > { %1805 = vst [vmem:[%s3406_s30 + $0x98] sm:$0xff] %v1753_v58 }
 0x220   : > { %v1731_v0 = vpop.f32.mrf.mxu1 }
 0x221   : > { %1796 = vst [vmem:[%s3406_s30 + $0x50] sm:$0xff] %v1731_v0 }
 0x226   : > { %v1711_v28 = vpop.f32.mrf.mxu0 }
 0x227   : > { %1788 = vst [vmem:[%s3406_s30 + $0x10] sm:$0xff] %v1711_v28 }
 0x228   : > { %v1733_v45 = vpop.f32.mrf.mxu1 }
 0x229   : > { %1797 = vst [vmem:[%s3406_s30 + $0x58] sm:$0xff] %v1733_v45 }
 0x22e   : > { %v1713_v50 = vpop.f32.mrf.mxu0 }
 0x22f   : > { %1789 = vst [vmem:[%s3406_s30 + $0x18] sm:$0xff] %v1713_v50 }
 0x23e   : > { %v1756_v52 = vpop.f32.mrf.mxu2 }
 0x23f   : > { %1806 = vst [vmem:[%s3406_s30 + $0xa0] sm:$0xff] %v1756_v52 }
 0x245   : > { %v1776_v27 = vpop.f32.mrf.mxu3 }
 0x246   : > { %1814 = vst [vmem:[%s3406_s30 + $0xe0] sm:$0xff] %v1776_v27  ;;  %v1758_v2 = vpop.f32.mrf.mxu2 }
 0x247   : > { %1807 = vst [vmem:[%s3406_s30 + $0xa8] sm:$0xff] %v1758_v2 }
 0x24d   : > { %v1778_v40 = vpop.f32.mrf.mxu3 }
 0x24e   : > { %1815 = vst [vmem:[%s3406_s30 + $0xe8] sm:$0xff] %v1778_v40 }
 0x250   : > { %v1716_v23 = vpop.f32.mrf.mxu0 }
 0x251   : > { %1790 = vst [vmem:[%s3406_s30 + $0x20] sm:$0xff] %v1716_v23 }
 0x257   : > { %v1736_v32 = vpop.f32.mrf.mxu1 }
 0x258   : > { %1798 = vst [vmem:[%s3406_s30 + $0x60] sm:$0xff] %v1736_v32  ;;  %v1718_v41 = vpop.f32.mrf.mxu0 }
 0x259   : > { %1791 = vst [vmem:[%s3406_s30 + $0x28] sm:$0xff] %v1718_v41 }
 0x25f   : > { %v1738_v5 = vpop.f32.mrf.mxu1 }
 0x260   : > { %1799 = vst [vmem:[%s3406_s30 + $0x68] sm:$0xff] %v1738_v5 }
 0x275   : > { %v1761_v38 = vpop.f32.mrf.mxu2 }
 0x276   : > { %1808 = vst [vmem:[%s3406_s30 + $0xb0] sm:$0xff] %v1761_v38 }
 0x27c   : > { %v1781_v43 = vpop.f32.mrf.mxu3 }
 0x27d   : > { %1816 = vst [vmem:[%s3406_s30 + $0xf0] sm:$0xff] %v1781_v43  ;;  %v1763_v3 = vpop.f32.mrf.mxu2 }
 0x27e   : > { %1809 = vst [vmem:[%s3406_s30 + $0xb8] sm:$0xff] %v1763_v3 }
 0x284   : > { %v1783_v9 = vpop.f32.mrf.mxu3 }
 0x285   : > { %1817 = vst [vmem:[%s3406_s30 + $0xf8] sm:$0xff] %v1783_v9 }
 0x288   : > { %v1741_v31 = vpop.f32.mrf.mxu1 }
 0x289   : > { %1800 = vst [vmem:[%s3406_s30 + $0x70] sm:$0xff] %v1741_v31 }
 0x28e   : > { %v1721_v39 = vpop.f32.mrf.mxu0 }
 0x28f   : > { %1792 = vst [vmem:[%s3406_s30 + $0x30] sm:$0xff] %v1721_v39 }
 0x290   : > { %v1743_v46 = vpop.f32.mrf.mxu1 }
 0x291   : > { %1801 = vst [vmem:[%s3406_s30 + $0x78] sm:$0xff] %v1743_v46 }
 0x296   : > { %v1723_v4 = vpop.f32.mrf.mxu0 }
 0x297   : > { %1793 = vst [vmem:[%s3406_s30 + $0x38] sm:$0xff] %v1723_v4 }
 0x298   : > { %2207 = shalt.err (!%p2204_p5)
}
 0x299   : > { %s2268_s27 = smov 128  }
 0x29a   : > { %2116 = dma.vmem_to_hbm [thread:$0]  (%p2334_p4), %s1836_s10, 4096, %s1838_s11, %s1819_s12, %s2268_s27, %s2268_s27, %s2261_s7  }
 0x29b PF: > { %p2122_p6 = scmp.ge.s32.totalorder %s2258_s19, 2  ;;  %s1852_s28 = sand.u32 1, %s2238_s15  }
 0x29c   : > { %s1853_s29 = scalar_lea.sflag [#allocation4], %s1852_s28 }
 0x29d   : > { %p2119_p7 = pnand %p2122_p6, %p2341_p8 }
 0x29f   : > { %p2120_p9 = pneg %p2119_p7 }
 0x2a1   : > { %2233 = dma.done.wait (%p2120_p9), %s1853_s29, 4096  }
 0x2a2   : > { %2235 = vsyncadd (%p2120_p9), %s1853_s29, 4294963200  ;;  %s17_s19 = sadd.s32 1, %s2258_s19   ;;  %s3574_s15 = smov %s2242_s16 }
 0x2a3   : > { %p14_p10 = scmp.ge.s32.totalorder %s17_s19, 4   ;;  %s3575_s16 = smov %s2246_s17 }
 0x2a4   : > { %s3576_s17 = smov %s2347_s26  ;;  %s3577_s18 = smov %s2254_s1 }
 0x2a5   : > { %s3578_s1 = smov %s3580_s21  ;;  %16 = sbr.rel (!%p14_p10) target bundleno = 4 (0x4), region = 81 }
 0x2aa   :  { %1859 = vsyncpa [#allocation4], 1 }
 0x2ab   :  { %1861 = vsyncpa [#allocation4 + $0x1], 1 }

</bundles_post_ra>
